<compile_context>
chip_gen: v6e
topology: v6e:2x2x1
jax: 0.10.0
libtpu: 0.0.40
codegen_flags: <defaults>
</compile_context>

<pallas_src>
import functools

import jax
import jax.numpy as jnp
from jax import lax
from jax.experimental import pallas as pl
from jax.experimental.pallas import tpu as pltpu


# ----------------------------------------------------------------------------
# Fused critic kernel (conv encoder + mean-pool + fused Q1|Q2 heads)
# ----------------------------------------------------------------------------
def _critic_fused_kernel(obs_ref, oa_ref, cw_ref, cb_ref,
                         qw1f_ref, qw1oa_ref, qb1_ref,
                         qw2_ref, qb2_ref, qw3_ref, qb3_ref,
                         out_ref, *, h_sp, w_sp, c_in, nf, n_layers):
    f32 = jnp.float32
    tb = obs_ref.shape[-1]                    # batch tile (lane axis)

    cw = cw_ref[...]                          # (L, nf, kmax)  folded-tap weights
    cb = cb_ref[...]                          # (L, nf, 1)     biases

    # ---- Layer 0: 2x2 taps pre-folded by the wrapper (space-to-depth). ----
    k0 = 4 * c_in
    p = h_sp * w_sp
    xs = obs_ref[...].astype(f32).reshape(p, k0, tb)          # (P0, 4*Cin, tb)
    wl = cw[0, :, :k0]                                         # (nf, 4*Cin)
    y = lax.dot_general(jnp.broadcast_to(wl, (p, nf, k0)), xs,
                        (((2,), (1,)), ((0,), (0,))),
                        preferred_element_type=f32)            # (P0, nf, tb)
    x = jnp.maximum(y + cb[0], 0.0)
    ch, cwid = h_sp, w_sp

    # ---- Layers 1..L-1: fold the 2x2 taps into the channel (K) axis. ----
    for layer in range(1, n_layers):
        ho, wo = ch // 2, cwid // 2
        xr = x.reshape(ch, cwid, nf, tb)
        if ch != 2 * ho or cwid != 2 * wo:    # odd spatial: floor-crop (k=2, s=2)
            xr = xr[:2 * ho, :2 * wo]
        xr = xr.reshape(ho, 2, wo, 2, nf, tb)
        p = ho * wo
        taps = [xr[:, kh, :, kw].reshape(p, nf, tb)
                for kh in range(2) for kw in range(2)]
        xs = jnp.concatenate(taps, axis=1)    # (P, 4*nf, tb): 8-aligned sublane concat
        k = 4 * nf
        wl = cw[layer, :, :k]                 # (nf, 4*nf)
        y = lax.dot_general(jnp.broadcast_to(wl, (p, nf, k)), xs,
                            (((2,), (1,)), ((0,), (0,))),
                            preferred_element_type=f32)        # (P, nf, tb)
        x = jnp.maximum(y + cb[layer], 0.0)
        ch, cwid = ho, wo

    # adaptive_avg_pool2d((1,1)) + squeeze == mean over remaining spatial rows.
    feat = jnp.mean(x, axis=0)                                 # (nf, tb)
    oa = oa_ref[...].astype(f32)                               # (n_oth + n_act, tb)

    # Fused Q1|Q2 head (block-diagonal), batch on lanes throughout.
    z = jnp.dot(qw1f_ref[...], feat, preferred_element_type=f32)
    z = z + jnp.dot(qw1oa_ref[...], oa, preferred_element_type=f32)
    z = jnp.maximum(z + qb1_ref[...], 0.0)                     # (128, tb)
    z = jnp.maximum(jnp.dot(qw2_ref[...], z, preferred_element_type=f32)
                    + qb2_ref[...], 0.0)                       # (64, tb)
    q = jnp.dot(qw3_ref[...], z, preferred_element_type=f32) + qb3_ref[...]  # (2, tb)
    out_ref[...] = q.astype(out_ref.dtype)                     # rows = [q1; q2]


# ----------------------------------------------------------------------------
# Public wrapper (PyTorch-style NCHW obs; returns (q1, q2) each (B, 1))
# ----------------------------------------------------------------------------
def critic_forward(params, obs, action, others, *, batch_tile=256):
    B, C, H, W = obs.shape
    assert action.shape[0] == B and others.shape[0] == B
    assert H >= 2 and W >= 2
    cw, cb = params["conv_w"], params["conv_b"]
    qw1f, qw1oa, qb1, qw2, qb2, qw3, qb3 = params["q"]
    n_layers, nf = cw.shape[0], cw.shape[1]
    n_oa = others.shape[1] + action.shape[1]

    H2, W2 = H // 2, W // 2
    # One-time layout change at the API boundary (kept in the source dtype; the
    # kernel casts to f32):  NCHW -> (H/2, W/2, kh*kw*C, B).  This folds layer
    # 0's 2x2 taps onto the K axis and puts the batch on the 128-lane axis.
    # It is the only XLA glue op of the forward; callers that already store
    # observations in this layout can skip it entirely.
    obs_f = obs[:, :, :2 * H2, :2 * W2].reshape(B, C, H2, 2, W2, 2)
    obs_f = jnp.transpose(obs_f, (2, 4, 3, 5, 1, 0)).reshape(H2, W2, 4 * C, B)
    oa = jnp.concatenate([others.astype(jnp.float32),
                          action.astype(jnp.float32)], axis=1).T        # (n_oa, B)

    # Batch tiling: batch sits on the lane axis, so a tile must either span the
    # whole batch or be a multiple of 128 lanes.
    if B < 256:
        tb, bp = B, B                                # single grid step
    else:
        tb = max(128, (batch_tile // 128) * 128)
        if B < 2 * tb:                               # >=2 steps -> both v7x TCs busy
            tb = 128
        bp = ((B + tb - 1) // tb) * tb
        if bp != B:
            pad = bp - B
            obs_f = jnp.pad(obs_f, ((0, 0), (0, 0), (0, 0), (0, pad)))
            oa = jnp.pad(oa, ((0, 0), (0, pad)))
    grid = (bp // tb,)

    def _full(a):
        return pl.BlockSpec(a.shape, lambda *_: (0,) * a.ndim)

    kernel = functools.partial(_critic_fused_kernel, h_sp=H2, w_sp=W2,
                               c_in=C, nf=nf, n_layers=n_layers)

    q12 = pl.pallas_call(
        kernel,
        out_shape=jax.ShapeDtypeStruct((2, bp), jnp.float32),
        grid=grid,
        in_specs=[
            pl.BlockSpec((H2, W2, 4 * C, tb), lambda i: (0, 0, 0, i)),
            pl.BlockSpec((n_oa, tb), lambda i: (0, i)),
            _full(cw), _full(cb),
            _full(qw1f), _full(qw1oa), _full(qb1),
            _full(qw2), _full(qb2), _full(qw3), _full(qb3),
        ],
        out_specs=pl.BlockSpec((2, tb), lambda i: (0, i)),
        compiler_params=pltpu.CompilerParams(dimension_semantics=("parallel",)),
    )(obs_f, oa, cw, cb, qw1f, qw1oa, qb1, qw2, qb2, qw3, qb3)

    q12 = q12[:, :B]
    return q12[0][:, None], q12[1][:, None]


# ----------------------------------------------------------------------------
# Parameter packing (PyTorch layouts -> fused kernel layouts)
# ----------------------------------------------------------------------------
def _pack_conv(conv_params, nf):
    """[(W (Cout,Cin,2,2), b (Cout,)), ...] -> cw (L, nf, 4*Cin_max), cb (L, nf, 1).

    K-axis ordering is k = (kh*2 + kw)*Cin + ci (matches the in-kernel tap fold
    and the wrapper's space-to-depth for layer 0).
    """
    n = len(conv_params)
    kmax = max(4 * w.shape[1] for w, _ in conv_params)
    cw = jnp.zeros((n, nf, kmax), jnp.float32)
    for l, (w, _) in enumerate(conv_params):
        co, ci = w.shape[0], w.shape[1]
        wt = jnp.transpose(w, (0, 2, 3, 1)).reshape(co, 4 * ci)   # (Cout, 4*Cin)
        cw = cw.at[l, :, :4 * ci].set(wt)
    cb = jnp.stack([b for _, b in conv_params], axis=0)[:, :, None]   # (L, nf, 1)
    return cw, cb


def _pack_q_heads(q1, q2, nf):
    """Fuse Q1/Q2 for batch-on-lanes compute: h_out = W @ h_in (+ b[:,None]).

    Layer1 weights stack along the output rows (128 = 64|64); layers 2/3 are
    block-diagonal so the two heads never mix.
    """
    (w1a, b1a), (w2a, b2a), (w3a, b3a) = q1
    (w1b, b1b), (w2b, b2b), (w3b, b3b) = q2
    qw1 = jnp.concatenate([w1a, w1b], axis=0)            # (128, nf + 5)
    qw1f, qw1oa = qw1[:, :nf], qw1[:, nf:]                # (128, nf), (128, 5)
    qb1 = jnp.concatenate([b1a, b1b])[:, None]            # (128, 1)
    z2 = jnp.zeros_like(w2a)
    qw2 = jnp.concatenate(
        [jnp.concatenate([w2a, z2], axis=1),
         jnp.concatenate([z2, w2b], axis=1)], axis=0)     # (64, 128)
    qb2 = jnp.concatenate([b2a, b2b])[:, None]            # (64, 1)
    z3 = jnp.zeros_like(w3a)
    qw3 = jnp.concatenate(
        [jnp.concatenate([w3a, z3], axis=1),
         jnp.concatenate([z3, w3b], axis=1)], axis=0)     # (2, 64)
    qb3 = jnp.concatenate([b3a, b3b])[:, None]            # (2, 1)
    return qw1f, qw1oa, qb1, qw2, qb2, qw3, qb3


def init_params(key, obs_channels=4, num_filters=8, n_others=3, n_action=2, scale=0.1):
    """Deterministic synthetic params in PyTorch layout + packed kernel layout."""
    ks = jax.random.split(key, 10)

    def conv(k, cin, cout):
        kw_, kb_ = jax.random.split(k)
        return (scale * jax.random.normal(kw_, (cout, cin, 2, 2), jnp.float32),
                scale * jax.random.normal(kb_, (cout,), jnp.float32))

    def lin(k, din, dout):
        kw_, kb_ = jax.random.split(k)
        return (scale * jax.random.normal(kw_, (dout, din), jnp.float32),
                scale * jax.random.normal(kb_, (dout,), jnp.float32))

    convs = [conv(ks[0], obs_channels, num_filters),
             conv(ks[1], num_filters, num_filters),
             conv(ks[2], num_filters, num_filters),
             conv(ks[3], num_filters, num_filters)]
    q_in = num_filters + n_others + n_action             # feature_dim + 5
    q1 = [lin(ks[4], q_in, 64), lin(ks[5], 64, 32), lin(ks[6], 32, 1)]
    q2 = [lin(ks[7], q_in, 64), lin(ks[8], 64, 32), lin(ks[9], 32, 1)]

    raw = {"convs": convs, "q1": q1, "q2": q2}
    cw, cb = _pack_conv(convs, num_filters)
    packed = {"conv_w": cw, "conv_b": cb, "q": _pack_q_heads(q1, q2, num_filters)}
    return packed, raw


# ----------------------------------------------------------------------------
# Pure-JAX (XLA) reference mirroring the PyTorch module, for a numeric check.
# ----------------------------------------------------------------------------
def critic_reference(raw, obs, action, others):
    x = obs.astype(jnp.float32)
    for w, b in raw["convs"]:
        x = lax.conv_general_dilated(x, w, window_strides=(2, 2), padding="VALID",
                                     dimension_numbers=("NCHW", "OIHW", "NCHW"))
        x = jax.nn.relu(x + b[None, :, None, None])
    feat = jnp.mean(x, axis=(2, 3))                   # adaptive_avg_pool2d((1,1)) + squeeze
    xq = jnp.concatenate([feat, others, action], axis=1)

    def head(p, z):
        (w1, b1), (w2, b2), (w3, b3) = p
        z = jax.nn.relu(z @ w1.T + b1)
        z = jax.nn.relu(z @ w2.T + b2)
        return z @ w3.T + b3

    return head(raw["q1"], xq), head(raw["q2"], xq)


# ----------------------------------------------------------------------------
if __name__ == "__main__":
    key = jax.random.PRNGKey(0)
    pkey, okey, akey, ckey = jax.random.split(key, 4)

    params, raw = init_params(pkey)

    # obs: (B, C, H, W) NCHW like PyTorch; H=W=16 -> four stride-2 convs -> 1x1.
    obs = jax.random.normal(okey, (2, 4, 16, 16), dtype=jnp.float32)
    # feature_dim(8) + others(3) + action(2) = 13 = feature_dim + 5
    action = jax.random.normal(akey, (2, 2), dtype=jnp.float32)
    others = jax.random.normal(ckey, (2, 3), dtype=jnp.float32)

    q1, q2 = jax.jit(critic_forward)(params, obs, action, others)
    jax.block_until_ready((q1, q2))

    assert q1.shape == (2, 1) and q2.shape == (2, 1)
    assert q1.dtype == jnp.float32 and q2.dtype == jnp.float32

    # Numerical check against the pure-JAX reference of the PyTorch module.
    r1, r2 = jax.jit(critic_reference)(raw, obs, action, others)
    assert jnp.allclose(q1, r1, atol=1e-4, rtol=1e-4)
    assert jnp.allclose(q2, r2, atol=1e-4, rtol=1e-4)

    print("KERNEL_OK")
</pallas_src>

<mosaic_0001>
module attributes {stable_mosaic.version = 11 : i64} {
  func.func @_critic_fused_kernel(%arg0: i32, %arg1: memref<8x8x16x2xf32, #tpu.memory_space<vmem>>, %arg2: memref<5x2xf32, #tpu.memory_space<vmem>>, %arg3: memref<4x8x32xf32, #tpu.memory_space<vmem>>, %arg4: memref<4x8x1xf32, #tpu.memory_space<vmem>>, %arg5: memref<128x8xf32, #tpu.memory_space<vmem>>, %arg6: memref<128x5xf32, #tpu.memory_space<vmem>>, %arg7: memref<128x1xf32, #tpu.memory_space<vmem>>, %arg8: memref<64x128xf32, #tpu.memory_space<vmem>>, %arg9: memref<64x1xf32, #tpu.memory_space<vmem>>, %arg10: memref<2x64xf32, #tpu.memory_space<vmem>>, %arg11: memref<2x1xf32, #tpu.memory_space<vmem>>, %arg12: memref<2x2xf32, #tpu.memory_space<vmem>>) attributes {dimension_semantics = [#tpu.dimension_semantics<parallel>], iteration_bounds = array<i64: 1>, scalar_prefetch = 0 : i64, scratch_operands = 0 : i64, tpu.core_type = #tpu.core_type<tc>, window_params = [{transform_indices = @transform_0, window_bounds = array<i64: 8, 8, 16, 2>}, {transform_indices = @transform_1, window_bounds = array<i64: 5, 2>}, {pipeline_mode = #tpu.pipeline_mode<synchronous>, transform_indices = @transform_2, window_bounds = array<i64: 4, 8, 32>}, {pipeline_mode = #tpu.pipeline_mode<synchronous>, transform_indices = @transform_3, window_bounds = array<i64: 4, 8, 1>}, {pipeline_mode = #tpu.pipeline_mode<synchronous>, transform_indices = @transform_4, window_bounds = array<i64: 128, 8>}, {pipeline_mode = #tpu.pipeline_mode<synchronous>, transform_indices = @transform_5, window_bounds = array<i64: 128, 5>}, {pipeline_mode = #tpu.pipeline_mode<synchronous>, transform_indices = @transform_6, window_bounds = array<i64: 128, 1>}, {pipeline_mode = #tpu.pipeline_mode<synchronous>, transform_indices = @transform_7, window_bounds = array<i64: 64, 128>}, {pipeline_mode = #tpu.pipeline_mode<synchronous>, transform_indices = @transform_8, window_bounds = array<i64: 64, 1>}, {pipeline_mode = #tpu.pipeline_mode<synchronous>, transform_indices = @transform_9, window_bounds = array<i64: 2, 64>}, {pipeline_mode = #tpu.pipeline_mode<synchronous>, transform_indices = @transform_10, window_bounds = array<i64: 2, 1>}, {transform_indices = @transform_11, window_bounds = array<i64: 2, 2>}]} {
    %c0 = arith.constant 0 : index
    %c0_0 = arith.constant 0 : index
    %c0_1 = arith.constant 0 : index
    %0 = vector.load %arg3[%c0, %c0_0, %c0_1] : memref<4x8x32xf32, #tpu.memory_space<vmem>>, vector<4x8x32xf32>
    %c0_2 = arith.constant 0 : index
    %c0_3 = arith.constant 0 : index
    %c0_4 = arith.constant 0 : index
    %1 = vector.load %arg4[%c0_2, %c0_3, %c0_4] : memref<4x8x1xf32, #tpu.memory_space<vmem>>, vector<4x8x1xf32>
    %c0_5 = arith.constant 0 : index
    %c0_6 = arith.constant 0 : index
    %c0_7 = arith.constant 0 : index
    %c0_8 = arith.constant 0 : index
    %2 = vector.load %arg1[%c0_5, %c0_6, %c0_7, %c0_8] : memref<8x8x16x2xf32, #tpu.memory_space<vmem>>, vector<8x8x16x2xf32>
    %3 = vector.shape_cast %2 : vector<8x8x16x2xf32> to vector<64x16x2xf32>
    %4 = vector.extract_strided_slice %0 {offsets = [0, 0, 0], sizes = [1, 8, 16], strides = [1, 1, 1]} : vector<4x8x32xf32> to vector<1x8x16xf32>
    %5 = vector.shape_cast %4 : vector<1x8x16xf32> to vector<8x16xf32>
    %6 = vector.shape_cast %5 : vector<8x16xf32> to vector<1x8x16xf32>
    %7 = vector.broadcast %6 : vector<1x8x16xf32> to vector<64x8x16xf32>
    %cst = arith.constant dense<0.000000e+00> : vector<64x8x2xf32>
    %8 = tpu.matmul %7, %3, %cst {dimension_numbers = #tpu.dot_dimension_numbers<[2], [1], [1], [2], [0, 0, 0, 1, 1, 2], [0], [0]>} : vector<64x8x16xf32>, vector<64x16x2xf32>, vector<64x8x2xf32> -> vector<64x8x2xf32>
    %9 = vector.extract_strided_slice %1 {offsets = [0, 0, 0], sizes = [1, 8, 1], strides = [1, 1, 1]} : vector<4x8x1xf32> to vector<1x8x1xf32>
    %10 = vector.shape_cast %9 : vector<1x8x1xf32> to vector<8x1xf32>
    %11 = vector.shape_cast %10 : vector<8x1xf32> to vector<1x8x1xf32>
    %12 = vector.broadcast %11 : vector<1x8x1xf32> to vector<64x8x2xf32>
    %13 = arith.addf %8, %12 : vector<64x8x2xf32>
    %cst_9 = arith.constant 0.000000e+00 : f32
    %14 = vector.broadcast %cst_9 : f32 to vector<64x8x2xf32>
    %15 = arith.maximumf %13, %14 : vector<64x8x2xf32>
    %16 = vector.shape_cast %15 : vector<64x8x2xf32> to vector<8x8x8x2xf32>
    %17 = vector.shape_cast %16 : vector<8x8x8x2xf32> to vector<4x2x4x2x8x2xf32>
    %18 = vector.extract_strided_slice %17 {offsets = [0, 0, 0, 0, 0, 0], sizes = [4, 1, 4, 1, 8, 2], strides = [1, 1, 1, 1, 1, 1]} : vector<4x2x4x2x8x2xf32> to vector<4x1x4x1x8x2xf32>
    %19 = vector.shape_cast %18 : vector<4x1x4x1x8x2xf32> to vector<4x4x8x2xf32>
    %20 = vector.shape_cast %19 : vector<4x4x8x2xf32> to vector<16x8x2xf32>
    %21 = vector.extract_strided_slice %17 {offsets = [0, 0, 0, 1, 0, 0], sizes = [4, 1, 4, 1, 8, 2], strides = [1, 1, 1, 1, 1, 1]} : vector<4x2x4x2x8x2xf32> to vector<4x1x4x1x8x2xf32>
    %22 = vector.shape_cast %21 : vector<4x1x4x1x8x2xf32> to vector<4x4x8x2xf32>
    %23 = vector.shape_cast %22 : vector<4x4x8x2xf32> to vector<16x8x2xf32>
    %24 = vector.extract_strided_slice %17 {offsets = [0, 1, 0, 0, 0, 0], sizes = [4, 1, 4, 1, 8, 2], strides = [1, 1, 1, 1, 1, 1]} : vector<4x2x4x2x8x2xf32> to vector<4x1x4x1x8x2xf32>
    %25 = vector.shape_cast %24 : vector<4x1x4x1x8x2xf32> to vector<4x4x8x2xf32>
    %26 = vector.shape_cast %25 : vector<4x4x8x2xf32> to vector<16x8x2xf32>
    %27 = vector.extract_strided_slice %17 {offsets = [0, 1, 0, 1, 0, 0], sizes = [4, 1, 4, 1, 8, 2], strides = [1, 1, 1, 1, 1, 1]} : vector<4x2x4x2x8x2xf32> to vector<4x1x4x1x8x2xf32>
    %28 = vector.shape_cast %27 : vector<4x1x4x1x8x2xf32> to vector<4x4x8x2xf32>
    %29 = vector.shape_cast %28 : vector<4x4x8x2xf32> to vector<16x8x2xf32>
    %30 = tpu.concatenate %20, %23, %26, %29 in 1 : vector<16x8x2xf32>, vector<16x8x2xf32>, vector<16x8x2xf32>, vector<16x8x2xf32> -> vector<16x32x2xf32>
    %31 = vector.extract_strided_slice %0 {offsets = [1, 0, 0], sizes = [1, 8, 32], strides = [1, 1, 1]} : vector<4x8x32xf32> to vector<1x8x32xf32>
    %32 = vector.shape_cast %31 : vector<1x8x32xf32> to vector<8x32xf32>
    %33 = vector.shape_cast %32 : vector<8x32xf32> to vector<1x8x32xf32>
    %34 = vector.broadcast %33 : vector<1x8x32xf32> to vector<16x8x32xf32>
    %cst_10 = arith.constant dense<0.000000e+00> : vector<16x8x2xf32>
    %35 = tpu.matmul %34, %30, %cst_10 {dimension_numbers = #tpu.dot_dimension_numbers<[2], [1], [1], [2], [0, 0, 0, 1, 1, 2], [0], [0]>} : vector<16x8x32xf32>, vector<16x32x2xf32>, vector<16x8x2xf32> -> vector<16x8x2xf32>
    %36 = vector.extract_strided_slice %1 {offsets = [1, 0, 0], sizes = [1, 8, 1], strides = [1, 1, 1]} : vector<4x8x1xf32> to vector<1x8x1xf32>
    %37 = vector.shape_cast %36 : vector<1x8x1xf32> to vector<8x1xf32>
    %38 = vector.shape_cast %37 : vector<8x1xf32> to vector<1x8x1xf32>
    %39 = vector.broadcast %38 : vector<1x8x1xf32> to vector<16x8x2xf32>
    %40 = arith.addf %35, %39 : vector<16x8x2xf32>
    %cst_11 = arith.constant 0.000000e+00 : f32
    %41 = vector.broadcast %cst_11 : f32 to vector<16x8x2xf32>
    %42 = arith.maximumf %40, %41 : vector<16x8x2xf32>
    %43 = vector.shape_cast %42 : vector<16x8x2xf32> to vector<4x4x8x2xf32>
    %44 = vector.shape_cast %43 : vector<4x4x8x2xf32> to vector<2x2x2x2x8x2xf32>
    %45 = vector.extract_strided_slice %44 {offsets = [0, 0, 0, 0, 0, 0], sizes = [2, 1, 2, 1, 8, 2], strides = [1, 1, 1, 1, 1, 1]} : vector<2x2x2x2x8x2xf32> to vector<2x1x2x1x8x2xf32>
    %46 = vector.shape_cast %45 : vector<2x1x2x1x8x2xf32> to vector<2x2x8x2xf32>
    %47 = vector.shape_cast %46 : vector<2x2x8x2xf32> to vector<4x8x2xf32>
    %48 = vector.extract_strided_slice %44 {offsets = [0, 0, 0, 1, 0, 0], sizes = [2, 1, 2, 1, 8, 2], strides = [1, 1, 1, 1, 1, 1]} : vector<2x2x2x2x8x2xf32> to vector<2x1x2x1x8x2xf32>
    %49 = vector.shape_cast %48 : vector<2x1x2x1x8x2xf32> to vector<2x2x8x2xf32>
    %50 = vector.shape_cast %49 : vector<2x2x8x2xf32> to vector<4x8x2xf32>
    %51 = vector.extract_strided_slice %44 {offsets = [0, 1, 0, 0, 0, 0], sizes = [2, 1, 2, 1, 8, 2], strides = [1, 1, 1, 1, 1, 1]} : vector<2x2x2x2x8x2xf32> to vector<2x1x2x1x8x2xf32>
    %52 = vector.shape_cast %51 : vector<2x1x2x1x8x2xf32> to vector<2x2x8x2xf32>
    %53 = vector.shape_cast %52 : vector<2x2x8x2xf32> to vector<4x8x2xf32>
    %54 = vector.extract_strided_slice %44 {offsets = [0, 1, 0, 1, 0, 0], sizes = [2, 1, 2, 1, 8, 2], strides = [1, 1, 1, 1, 1, 1]} : vector<2x2x2x2x8x2xf32> to vector<2x1x2x1x8x2xf32>
    %55 = vector.shape_cast %54 : vector<2x1x2x1x8x2xf32> to vector<2x2x8x2xf32>
    %56 = vector.shape_cast %55 : vector<2x2x8x2xf32> to vector<4x8x2xf32>
    %57 = tpu.concatenate %47, %50, %53, %56 in 1 : vector<4x8x2xf32>, vector<4x8x2xf32>, vector<4x8x2xf32>, vector<4x8x2xf32> -> vector<4x32x2xf32>
    %58 = vector.extract_strided_slice %0 {offsets = [2, 0, 0], sizes = [1, 8, 32], strides = [1, 1, 1]} : vector<4x8x32xf32> to vector<1x8x32xf32>
    %59 = vector.shape_cast %58 : vector<1x8x32xf32> to vector<8x32xf32>
    %60 = vector.shape_cast %59 : vector<8x32xf32> to vector<1x8x32xf32>
    %61 = vector.broadcast %60 : vector<1x8x32xf32> to vector<4x8x32xf32>
    %cst_12 = arith.constant dense<0.000000e+00> : vector<4x8x2xf32>
    %62 = tpu.matmul %61, %57, %cst_12 {dimension_numbers = #tpu.dot_dimension_numbers<[2], [1], [1], [2], [0, 0, 0, 1, 1, 2], [0], [0]>} : vector<4x8x32xf32>, vector<4x32x2xf32>, vector<4x8x2xf32> -> vector<4x8x2xf32>
    %63 = vector.extract_strided_slice %1 {offsets = [2, 0, 0], sizes = [1, 8, 1], strides = [1, 1, 1]} : vector<4x8x1xf32> to vector<1x8x1xf32>
    %64 = vector.shape_cast %63 : vector<1x8x1xf32> to vector<8x1xf32>
    %65 = vector.shape_cast %64 : vector<8x1xf32> to vector<1x8x1xf32>
    %66 = vector.broadcast %65 : vector<1x8x1xf32> to vector<4x8x2xf32>
    %67 = arith.addf %62, %66 : vector<4x8x2xf32>
    %cst_13 = arith.constant 0.000000e+00 : f32
    %68 = vector.broadcast %cst_13 : f32 to vector<4x8x2xf32>
    %69 = arith.maximumf %67, %68 : vector<4x8x2xf32>
    %70 = vector.shape_cast %69 : vector<4x8x2xf32> to vector<2x2x8x2xf32>
    %71 = vector.shape_cast %70 : vector<2x2x8x2xf32> to vector<1x2x1x2x8x2xf32>
    %72 = vector.extract_strided_slice %71 {offsets = [0, 0, 0, 0, 0, 0], sizes = [1, 1, 1, 1, 8, 2], strides = [1, 1, 1, 1, 1, 1]} : vector<1x2x1x2x8x2xf32> to vector<1x1x1x1x8x2xf32>
    %73 = vector.shape_cast %72 : vector<1x1x1x1x8x2xf32> to vector<1x1x8x2xf32>
    %74 = vector.shape_cast %73 : vector<1x1x8x2xf32> to vector<1x8x2xf32>
    %75 = vector.extract_strided_slice %71 {offsets = [0, 0, 0, 1, 0, 0], sizes = [1, 1, 1, 1, 8, 2], strides = [1, 1, 1, 1, 1, 1]} : vector<1x2x1x2x8x2xf32> to vector<1x1x1x1x8x2xf32>
    %76 = vector.shape_cast %75 : vector<1x1x1x1x8x2xf32> to vector<1x1x8x2xf32>
    %77 = vector.shape_cast %76 : vector<1x1x8x2xf32> to vector<1x8x2xf32>
    %78 = vector.extract_strided_slice %71 {offsets = [0, 1, 0, 0, 0, 0], sizes = [1, 1, 1, 1, 8, 2], strides = [1, 1, 1, 1, 1, 1]} : vector<1x2x1x2x8x2xf32> to vector<1x1x1x1x8x2xf32>
    %79 = vector.shape_cast %78 : vector<1x1x1x1x8x2xf32> to vector<1x1x8x2xf32>
    %80 = vector.shape_cast %79 : vector<1x1x8x2xf32> to vector<1x8x2xf32>
    %81 = vector.extract_strided_slice %71 {offsets = [0, 1, 0, 1, 0, 0], sizes = [1, 1, 1, 1, 8, 2], strides = [1, 1, 1, 1, 1, 1]} : vector<1x2x1x2x8x2xf32> to vector<1x1x1x1x8x2xf32>
    %82 = vector.shape_cast %81 : vector<1x1x1x1x8x2xf32> to vector<1x1x8x2xf32>
    %83 = vector.shape_cast %82 : vector<1x1x8x2xf32> to vector<1x8x2xf32>
    %84 = tpu.concatenate %74, %77, %80, %83 in 1 : vector<1x8x2xf32>, vector<1x8x2xf32>, vector<1x8x2xf32>, vector<1x8x2xf32> -> vector<1x32x2xf32>
    %85 = vector.extract_strided_slice %0 {offsets = [3, 0, 0], sizes = [1, 8, 32], strides = [1, 1, 1]} : vector<4x8x32xf32> to vector<1x8x32xf32>
    %86 = vector.shape_cast %85 : vector<1x8x32xf32> to vector<8x32xf32>
    %87 = vector.shape_cast %86 : vector<8x32xf32> to vector<1x8x32xf32>
    %cst_14 = arith.constant dense<0.000000e+00> : vector<1x8x2xf32>
    %88 = tpu.matmul %87, %84, %cst_14 {dimension_numbers = #tpu.dot_dimension_numbers<[2], [1], [1], [2], [0, 0, 0, 1, 1, 2], [0], [0]>} : vector<1x8x32xf32>, vector<1x32x2xf32>, vector<1x8x2xf32> -> vector<1x8x2xf32>
    %89 = vector.extract_strided_slice %1 {offsets = [3, 0, 0], sizes = [1, 8, 1], strides = [1, 1, 1]} : vector<4x8x1xf32> to vector<1x8x1xf32>
    %90 = vector.shape_cast %89 : vector<1x8x1xf32> to vector<8x1xf32>
    %91 = vector.shape_cast %90 : vector<8x1xf32> to vector<1x8x1xf32>
    %92 = vector.broadcast %91 : vector<1x8x1xf32> to vector<1x8x2xf32>
    %93 = arith.addf %88, %92 : vector<1x8x2xf32>
    %cst_15 = arith.constant 0.000000e+00 : f32
    %94 = vector.broadcast %cst_15 : f32 to vector<1x8x2xf32>
    %95 = arith.maximumf %93, %94 : vector<1x8x2xf32>
    %cst_16 = arith.constant dense<0.000000e+00> : vector<8x2xf32>
    %96 = vector.multi_reduction <add>, %95, %cst_16 [0] : vector<1x8x2xf32> to vector<8x2xf32>
    %cst_17 = arith.constant 1.000000e+00 : f32
    %97 = vector.broadcast %cst_17 : f32 to vector<8x2xf32>
    %98 = arith.divf %96, %97 : vector<8x2xf32>
    %c0_18 = arith.constant 0 : index
    %c0_19 = arith.constant 0 : index
    %99 = vector.load %arg2[%c0_18, %c0_19] : memref<5x2xf32, #tpu.memory_space<vmem>>, vector<5x2xf32>
    %c0_20 = arith.constant 0 : index
    %c0_21 = arith.constant 0 : index
    %100 = vector.load %arg5[%c0_20, %c0_21] : memref<128x8xf32, #tpu.memory_space<vmem>>, vector<128x8xf32>
    %cst_22 = arith.constant dense<0.000000e+00> : vector<128x2xf32>
    %101 = tpu.matmul %100, %98, %cst_22 {dimension_numbers = #tpu.dot_dimension_numbers<[1], [0], [0], [1], [0, 0, 1, 1], [], []>} : vector<128x8xf32>, vector<8x2xf32>, vector<128x2xf32> -> vector<128x2xf32>
    %c0_23 = arith.constant 0 : index
    %c0_24 = arith.constant 0 : index
    %102 = vector.load %arg6[%c0_23, %c0_24] : memref<128x5xf32, #tpu.memory_space<vmem>>, vector<128x5xf32>
    %cst_25 = arith.constant dense<0.000000e+00> : vector<128x2xf32>
    %103 = tpu.matmul %102, %99, %cst_25 {dimension_numbers = #tpu.dot_dimension_numbers<[1], [0], [0], [1], [0, 0, 1, 1], [], []>} : vector<128x5xf32>, vector<5x2xf32>, vector<128x2xf32> -> vector<128x2xf32>
    %104 = arith.addf %101, %103 : vector<128x2xf32>
    %c0_26 = arith.constant 0 : index
    %c0_27 = arith.constant 0 : index
    %105 = vector.load %arg7[%c0_26, %c0_27] : memref<128x1xf32, #tpu.memory_space<vmem>>, vector<128x1xf32>
    %106 = vector.broadcast %105 : vector<128x1xf32> to vector<128x2xf32>
    %107 = arith.addf %104, %106 : vector<128x2xf32>
    %cst_28 = arith.constant 0.000000e+00 : f32
    %108 = vector.broadcast %cst_28 : f32 to vector<128x2xf32>
    %109 = arith.maximumf %107, %108 : vector<128x2xf32>
    %c0_29 = arith.constant 0 : index
    %c0_30 = arith.constant 0 : index
    %110 = vector.load %arg8[%c0_29, %c0_30] : memref<64x128xf32, #tpu.memory_space<vmem>>, vector<64x128xf32>
    %cst_31 = arith.constant dense<0.000000e+00> : vector<64x2xf32>
    %111 = tpu.matmul %110, %109, %cst_31 {dimension_numbers = #tpu.dot_dimension_numbers<[1], [0], [0], [1], [0, 0, 1, 1], [], []>} : vector<64x128xf32>, vector<128x2xf32>, vector<64x2xf32> -> vector<64x2xf32>
    %c0_32 = arith.constant 0 : index
    %c0_33 = arith.constant 0 : index
    %112 = vector.load %arg9[%c0_32, %c0_33] : memref<64x1xf32, #tpu.memory_space<vmem>>, vector<64x1xf32>
    %113 = vector.broadcast %112 : vector<64x1xf32> to vector<64x2xf32>
    %114 = arith.addf %111, %113 : vector<64x2xf32>
    %cst_34 = arith.constant 0.000000e+00 : f32
    %115 = vector.broadcast %cst_34 : f32 to vector<64x2xf32>
    %116 = arith.maximumf %114, %115 : vector<64x2xf32>
    %c0_35 = arith.constant 0 : index
    %c0_36 = arith.constant 0 : index
    %117 = vector.load %arg10[%c0_35, %c0_36] : memref<2x64xf32, #tpu.memory_space<vmem>>, vector<2x64xf32>
    %cst_37 = arith.constant dense<0.000000e+00> : vector<2x2xf32>
    %118 = tpu.matmul %117, %116, %cst_37 {dimension_numbers = #tpu.dot_dimension_numbers<[1], [0], [0], [1], [0, 0, 1, 1], [], []>} : vector<2x64xf32>, vector<64x2xf32>, vector<2x2xf32> -> vector<2x2xf32>
    %c0_38 = arith.constant 0 : index
    %c0_39 = arith.constant 0 : index
    %119 = vector.load %arg11[%c0_38, %c0_39] : memref<2x1xf32, #tpu.memory_space<vmem>>, vector<2x1xf32>
    %120 = vector.broadcast %119 : vector<2x1xf32> to vector<2x2xf32>
    %121 = arith.addf %118, %120 : vector<2x2xf32>
    %c0_40 = arith.constant 0 : index
    %c0_41 = arith.constant 0 : index
    %122 = vector.load %arg12[%c0_40, %c0_41] : memref<2x2xf32, #tpu.memory_space<vmem>>, vector<2x2xf32>
    tpu.vector_store %arg12[%c0_40, %c0_41], %121 {strides = array<i32>} : memref<2x2xf32, #tpu.memory_space<vmem>>, vector<2x2xf32>,
    return
  }
  func.func @transform_0(%arg0: i32) -> (i32, i32, i32, i32) {
    %c0_i32 = arith.constant 0 : i32
    %c0_i32_0 = arith.constant 0 : i32
    %c0_i32_1 = arith.constant 0 : i32
    %c0_i32_2 = arith.constant 0 : i32
    return %c0_i32, %c0_i32_0, %c0_i32_1, %arg0 : i32, i32, i32, i32
  }
  func.func @transform_1(%arg0: i32) -> (i32, i32) {
    %c0_i32 = arith.constant 0 : i32
    %c0_i32_0 = arith.constant 0 : i32
    return %c0_i32, %arg0 : i32, i32
  }
  func.func @transform_2(%arg0: i32) -> (i32, i32, i32) {
    %c0_i32 = arith.constant 0 : i32
    %c0_i32_0 = arith.constant 0 : i32
    %c0_i32_1 = arith.constant 0 : i32
    %c0_i32_2 = arith.constant 0 : i32
    return %c0_i32, %c0_i32_0, %c0_i32_1 : i32, i32, i32
  }
  func.func @transform_3(%arg0: i32) -> (i32, i32, i32) {
    %c0_i32 = arith.constant 0 : i32
    %c0_i32_0 = arith.constant 0 : i32
    %c0_i32_1 = arith.constant 0 : i32
    %c0_i32_2 = arith.constant 0 : i32
    return %c0_i32, %c0_i32_0, %c0_i32_1 : i32, i32, i32
  }
  func.func @transform_4(%arg0: i32) -> (i32, i32) {
    %c0_i32 = arith.constant 0 : i32
    %c0_i32_0 = arith.constant 0 : i32
    %c0_i32_1 = arith.constant 0 : i32
    return %c0_i32, %c0_i32_0 : i32, i32
  }
  func.func @transform_5(%arg0: i32) -> (i32, i32) {
    %c0_i32 = arith.constant 0 : i32
    %c0_i32_0 = arith.constant 0 : i32
    %c0_i32_1 = arith.constant 0 : i32
    return %c0_i32, %c0_i32_0 : i32, i32
  }
  func.func @transform_6(%arg0: i32) -> (i32, i32) {
    %c0_i32 = arith.constant 0 : i32
    %c0_i32_0 = arith.constant 0 : i32
    %c0_i32_1 = arith.constant 0 : i32
    return %c0_i32, %c0_i32_0 : i32, i32
  }
  func.func @transform_7(%arg0: i32) -> (i32, i32) {
    %c0_i32 = arith.constant 0 : i32
    %c0_i32_0 = arith.constant 0 : i32
    %c0_i32_1 = arith.constant 0 : i32
    return %c0_i32, %c0_i32_0 : i32, i32
  }
  func.func @transform_8(%arg0: i32) -> (i32, i32) {
    %c0_i32 = arith.constant 0 : i32
    %c0_i32_0 = arith.constant 0 : i32
    %c0_i32_1 = arith.constant 0 : i32
    return %c0_i32, %c0_i32_0 : i32, i32
  }
  func.func @transform_9(%arg0: i32) -> (i32, i32) {
    %c0_i32 = arith.constant 0 : i32
    %c0_i32_0 = arith.constant 0 : i32
    %c0_i32_1 = arith.constant 0 : i32
    return %c0_i32, %c0_i32_0 : i32, i32
  }
  func.func @transform_10(%arg0: i32) -> (i32, i32) {
    %c0_i32 = arith.constant 0 : i32
    %c0_i32_0 = arith.constant 0 : i32
    %c0_i32_1 = arith.constant 0 : i32
    return %c0_i32, %c0_i32_0 : i32, i32
  }
  func.func @transform_11(%arg0: i32) -> (i32, i32) {
    %c0_i32 = arith.constant 0 : i32
    %c0_i32_0 = arith.constant 0 : i32
    return %c0_i32, %arg0 : i32, i32
  }
}

</mosaic_0001>

<bundles_post_ra>
// kernel: critic_forward.1
= control target key start
LH: loop header
LB: loop body
LE: loop exit
PB: predicated region body
PF: predicated region fallthrough
CT: control target
= control target key end

     0   :  { %v8336_v0 = vmov 0.0   ;;  %vm179_vm0 = vcmask 130048   ;;  %vm8337_vm1 = vmmov 0   ;;  %vm4732_vm2 = vcmask 261120   ;;  %s9770_s0 = inlined_call_operand.vmem [shape: f32[8,8,16,2], index: 0, kind: input, shape index: {}]   ;;  %s9771_s2 = inlined_call_operand.vmem [shape: f32[4,8,32], index: 2, kind: input, shape index: {}]   ;;  %s9772_s3 = inlined_call_operand.vmem [shape: f32[4,8,1], index: 3, kind: input, shape index: {}]   ;;  %s9773_s6 = inlined_call_operand.vmem [shape: f32[128,1], index: 6, kind: input, shape index: {}]   ;;  %s9774_s8 = inlined_call_operand.vmem [shape: f32[64,1], index: 8, kind: input, shape index: {}]   ;;  %s9775_s10 = inlined_call_operand.vmem [shape: f32[2,1], index: 10, kind: input, shape index: {}]   ;;  %s9776_s1 = inlined_call_operand.vmem [shape: f32[5,2], index: 1, kind: input, shape index: {}]   ;;  %s9777_s5 = inlined_call_operand.vmem [shape: f32[128,5], index: 5, kind: input, shape index: {}]   ;;  %s9778_s4 = inlined_call_operand.vmem [shape: f32[128,8], index: 4, kind: input, shape index: {}]   ;;  %s9779_s7 = inlined_call_operand.vmem [shape: f32[64,128], index: 7, kind: input, shape index: {}]   ;;  %s9780_s9 = inlined_call_operand.vmem [shape: f32[2,64], index: 9, kind: input, shape index: {}]   ;;  %s9781_s11 = inlined_call_operand.vmem [shape: f32[2,2], index: 11, kind: output, shape index: {}]  }
   0x1   :  { %7536 = vmatprep.subr.mxu0 %v8336_v0  ;;  %7543 = vmatprep.subr.mxu1 %v8336_v0  ;;  %v47_v1 = vld [vmem:[%s9770_s0 + $0x8] sm:$0xff]  ;;  %v49_v2 = vld [vmem:[%s9770_s0 + $0x18] sm:$0xff]  ;;  %v46_v3 = vld [vmem:[%s9770_s0] sm:$0xff]  ;;  %vm6326_vm3 = vcmask 1044480   ;;  %vm6277_vm4 = vcmask 39936   ;;  %vm6475_vm5 = vcmask 64512  }
   0x2   :  { %7537 = vmatpush3.msra.mxu0 %v47_v1  ;;  %7544 = vmatpush3.msra.mxu1 %v49_v2  ;;  %v48_v4 = vld [vmem:[%s9770_s0 + $0x10] sm:$0xff]  ;;  %v8418_v5 = vld [vmem:[%s9771_s2] sm:$0xff]  ;;  %v51_v6 = vld [vmem:[%s9770_s0 + $0x28] sm:$0xff]  ;;  %vm6973_vm6 = vcmask 523264   ;;  %vm7047_vm7 = vcmask 9216  }
   0x3   :  { %7538 = vmatprep.subr.mxu0 %v8336_v0  ;;  %7545 = vmatprep.subr.mxu1 %v8336_v0  ;;  %v53_v7 = vld [vmem:[%s9770_s0 + $0x38] sm:$0xff]  ;;  %v50_v8 = vld [vmem:[%s9770_s0 + $0x20] sm:$0xff]  ;;  %v52_v9 = vld [vmem:[%s9770_s0 + $0x30] sm:$0xff] }
   0x4   :  { %7539 = vmatpush3.msra.mxu0 %v46_v3  ;;  %7540 = vmatprep.mubr.msk.f32.mxu0 %vm8337_vm1, %v8336_v0  ;;  %v55_v10 = vld [vmem:[%s9770_s0 + $0x48] sm:$0xff]  ;;  %v57_v11 = vld [vmem:[%s9770_s0 + $0x58] sm:$0xff]  ;;  %v54_v12 = vld [vmem:[%s9770_s0 + $0x40] sm:$0xff] }
   0x5   :  { %7546 = vmatpush3.msra.mxu1 %v48_v4  ;;  %7547 = vmatprep.mubr.msk.f32.mxu1 %vm8337_vm1, %v8336_v0  ;;  %v56_v13 = vld [vmem:[%s9770_s0 + $0x50] sm:$0xff]  ;;  %v59_v14 = vld [vmem:[%s9770_s0 + $0x68] sm:$0xff]  ;;  %v61_v15 = vld [vmem:[%s9770_s0 + $0x78] sm:$0xff] }
   0x6   :  { %7541 = vmatmul.mubr.msk.f32.vlgmr.msra.gmra.mxu0 %vm179_vm0, %v8418_v5  ;;  %7548 = vmatmul.mubr.msk.f32.vlgmr.msra.gmra.mxu1 %vm179_vm0, %v8418_v5  ;;  %v58_v16 = vld [vmem:[%s9770_s0 + $0x60] sm:$0xff]  ;;  %v60_v17 = vld [vmem:[%s9770_s0 + $0x70] sm:$0xff]  ;;  %v63_v18 = vld [vmem:[%s9770_s0 + $0x88] sm:$0xff] }
   0x7   :  { %7550 = vmatprep.subr.mxu0 %v8336_v0  ;;  %7557 = vmatprep.subr.mxu1 %v8336_v0  ;;  %v65_v19 = vld [vmem:[%s9770_s0 + $0x98] sm:$0xff]  ;;  %v62_v20 = vld [vmem:[%s9770_s0 + $0x80] sm:$0xff]  ;;  %v64_v21 = vld [vmem:[%s9770_s0 + $0x90] sm:$0xff] }
   0x8   :  { %7551 = vmatpush3.msra.mxu0 %v51_v6  ;;  %7558 = vmatpush3.msra.mxu1 %v53_v7  ;;  %v67_v22 = vld [vmem:[%s9770_s0 + $0xa8] sm:$0xff]  ;;  %v69_v23 = vld [vmem:[%s9770_s0 + $0xb8] sm:$0xff]  ;;  %v66_v24 = vld [vmem:[%s9770_s0 + $0xa0] sm:$0xff] }
   0x9   :  { %7552 = vmatprep.subr.mxu0 %v8336_v0  ;;  %7559 = vmatprep.subr.mxu1 %v8336_v0  ;;  %v68_v25 = vld [vmem:[%s9770_s0 + $0xb0] sm:$0xff]  ;;  %v71_v26 = vld [vmem:[%s9770_s0 + $0xc8] sm:$0xff]  ;;  %v73_v27 = vld [vmem:[%s9770_s0 + $0xd8] sm:$0xff] }
   0xa   :  { %7553 = vmatpush3.msra.mxu0 %v50_v8  ;;  %7554 = vmatprep.mubr.msk.f32.mxu0 %vm8337_vm1, %v8336_v0  ;;  %v70_v28 = vld [vmem:[%s9770_s0 + $0xc0] sm:$0xff]  ;;  %v72_v29 = vld [vmem:[%s9770_s0 + $0xd0] sm:$0xff]  ;;  %v75_v30 = vld [vmem:[%s9770_s0 + $0xe8] sm:$0xff] }
   0xb   :  { %7560 = vmatpush3.msra.mxu1 %v52_v9  ;;  %7561 = vmatprep.mubr.msk.f32.mxu1 %vm8337_vm1, %v8336_v0  ;;  %v77_v31 = vld [vmem:[%s9770_s0 + $0xf8] sm:$0xff]  ;;  %v74_v32 = vld [vmem:[%s9770_s0 + $0xe0] sm:$0xff]  ;;  %v76_v33 = vld [vmem:[%s9770_s0 + $0xf0] sm:$0xff] }
   0xc   :  { %7555 = vmatmul.mubr.msk.f32.vlgmr.msra.gmra.mxu0 %vm179_vm0, %v8418_v5  ;;  %7562 = vmatmul.mubr.msk.f32.vlgmr.msra.gmra.mxu1 %vm179_vm0, %v8418_v5  ;;  %v79_v34 = vld [vmem:[%s9770_s0 + $0x108] sm:$0xff]  ;;  %v81_v35 = vld [vmem:[%s9770_s0 + $0x118] sm:$0xff]  ;;  %v78_v36 = vld [vmem:[%s9770_s0 + $0x100] sm:$0xff] }
   0xd   :  { %7564 = vmatprep.subr.mxu0 %v8336_v0  ;;  %7571 = vmatprep.subr.mxu1 %v8336_v0  ;;  %v80_v37 = vld [vmem:[%s9770_s0 + $0x110] sm:$0xff]  ;;  %v83_v38 = vld [vmem:[%s9770_s0 + $0x128] sm:$0xff]  ;;  %v85_v39 = vld [vmem:[%s9770_s0 + $0x138] sm:$0xff] }
   0xe   :  { %7565 = vmatpush3.msra.mxu0 %v55_v10  ;;  %7572 = vmatpush3.msra.mxu1 %v57_v11  ;;  %v82_v40 = vld [vmem:[%s9770_s0 + $0x120] sm:$0xff]  ;;  %v84_v41 = vld [vmem:[%s9770_s0 + $0x130] sm:$0xff]  ;;  %v87_v42 = vld [vmem:[%s9770_s0 + $0x148] sm:$0xff] }
   0xf   :  { %7566 = vmatprep.subr.mxu0 %v8336_v0  ;;  %7573 = vmatprep.subr.mxu1 %v8336_v0  ;;  %v89_v43 = vld [vmem:[%s9770_s0 + $0x158] sm:$0xff]  ;;  %v86_v44 = vld [vmem:[%s9770_s0 + $0x140] sm:$0xff]  ;;  %v88_v45 = vld [vmem:[%s9770_s0 + $0x150] sm:$0xff] }
  0x10   :  { %7567 = vmatpush3.msra.mxu0 %v54_v12  ;;  %7568 = vmatprep.mubr.msk.f32.mxu0 %vm8337_vm1, %v8336_v0  ;;  %v91_v46 = vld [vmem:[%s9770_s0 + $0x168] sm:$0xff]  ;;  %v93_v47 = vld [vmem:[%s9770_s0 + $0x178] sm:$0xff]  ;;  %v90_v48 = vld [vmem:[%s9770_s0 + $0x160] sm:$0xff] }
  0x11   :  { %7574 = vmatpush3.msra.mxu1 %v56_v13  ;;  %7575 = vmatprep.mubr.msk.f32.mxu1 %vm8337_vm1, %v8336_v0  ;;  %v92_v49 = vld [vmem:[%s9770_s0 + $0x170] sm:$0xff]  ;;  %v95_v50 = vld [vmem:[%s9770_s0 + $0x188] sm:$0xff]  ;;  %v97_v51 = vld [vmem:[%s9770_s0 + $0x198] sm:$0xff]  ;;  %v8338_v13 = vmov 0  }
  0x12   :  { %7569 = vmatmul.mubr.msk.f32.vlgmr.msra.gmra.mxu0 %vm179_vm0, %v8418_v5  ;;  %7576 = vmatmul.mubr.msk.f32.vlgmr.msra.gmra.mxu1 %vm179_vm0, %v8418_v5  ;;  %v94_v52 = vld [vmem:[%s9770_s0 + $0x180] sm:$0xff]  ;;  %v96_v53 = vld [vmem:[%s9770_s0 + $0x190] sm:$0xff]  ;;  %v99_v54 = vld [vmem:[%s9770_s0 + $0x1a8] sm:$0xff] }
  0x13   :  { %7578 = vmatprep.subr.mxu0 %v8336_v0  ;;  %7585 = vmatprep.subr.mxu1 %v8336_v0  ;;  %v101_v55 = vld [vmem:[%s9770_s0 + $0x1b8] sm:$0xff]  ;;  %v98_v56 = vld [vmem:[%s9770_s0 + $0x1a0] sm:$0xff]  ;;  %v100_v57 = vld [vmem:[%s9770_s0 + $0x1b0] sm:$0xff] }
  0x14   :  { %7579 = vmatpush3.msra.mxu0 %v59_v14  ;;  %7586 = vmatpush3.msra.mxu1 %v61_v15  ;;  %v103_v58 = vld [vmem:[%s9770_s0 + $0x1c8] sm:$0xff]  ;;  %v105_v59 = vld [vmem:[%s9770_s0 + $0x1d8] sm:$0xff]  ;;  %v102_v60 = vld [vmem:[%s9770_s0 + $0x1c0] sm:$0xff] }
  0x15   :  { %7580 = vmatprep.subr.mxu0 %v8336_v0  ;;  %7587 = vmatprep.subr.mxu1 %v8336_v0  ;;  %v104_v61 = vld [vmem:[%s9770_s0 + $0x1d0] sm:$0xff]  ;;  %v107_v62 = vld [vmem:[%s9770_s0 + $0x1e8] sm:$0xff]  ;;  %v109_v63 = vld [vmem:[%s9770_s0 + $0x1f8] sm:$0xff] }
  0x16   :  { %7581 = vmatpush3.msra.mxu0 %v58_v16  ;;  %7582 = vmatprep.mubr.msk.f32.mxu0 %vm8337_vm1, %v8336_v0  ;;  %v106_v1 = vld [vmem:[%s9770_s0 + $0x1e0] sm:$0xff]  ;;  %v108_v2 = vld [vmem:[%s9770_s0 + $0x1f0] sm:$0xff]  ;;  %v111_v3 = vld [vmem:[%s9770_s0 + $0x208] sm:$0xff] }
  0x17   :  { %7588 = vmatpush3.msra.mxu1 %v60_v17  ;;  %7589 = vmatprep.mubr.msk.f32.mxu1 %vm8337_vm1, %v8336_v0  ;;  %v113_v4 = vld [vmem:[%s9770_s0 + $0x218] sm:$0xff]  ;;  %v110_v6 = vld [vmem:[%s9770_s0 + $0x200] sm:$0xff]  ;;  %v112_v7 = vld [vmem:[%s9770_s0 + $0x210] sm:$0xff] }
  0x18   :  { %7583 = vmatmul.mubr.msk.f32.vlgmr.msra.gmra.mxu0 %vm179_vm0, %v8418_v5  ;;  %7590 = vmatmul.mubr.msk.f32.vlgmr.msra.gmra.mxu1 %vm179_vm0, %v8418_v5  ;;  %v115_v8 = vld [vmem:[%s9770_s0 + $0x228] sm:$0xff]  ;;  %v117_v9 = vld [vmem:[%s9770_s0 + $0x238] sm:$0xff]  ;;  %v114_v10 = vld [vmem:[%s9770_s0 + $0x220] sm:$0xff] }
  0x19   :  { %7592 = vmatprep.subr.mxu0 %v8336_v0  ;;  %7599 = vmatprep.subr.mxu1 %v8336_v0  ;;  %v116_v11 = vld [vmem:[%s9770_s0 + $0x230] sm:$0xff]  ;;  %v42_v12 = vld [vmem:[%s9772_s3] sm:$0xff]  ;;  %v119_v14 = vld [vmem:[%s9770_s0 + $0x248] sm:$0xff] }
  0x1a   :  { %7593 = vmatpush3.msra.mxu0 %v63_v18  ;;  %7600 = vmatpush3.msra.mxu1 %v65_v19  ;;  %v121_v15 = vld [vmem:[%s9770_s0 + $0x258] sm:$0xff]  ;;  %v118_v16 = vld [vmem:[%s9770_s0 + $0x240] sm:$0xff]  ;;  %v120_v17 = vld [vmem:[%s9770_s0 + $0x250] sm:$0xff] }
  0x1b   :  { %7594 = vmatprep.subr.mxu0 %v8336_v0  ;;  %7601 = vmatprep.subr.mxu1 %v8336_v0  ;;  %v123_v18 = vld [vmem:[%s9770_s0 + $0x268] sm:$0xff]  ;;  %v125_v19 = vld [vmem:[%s9770_s0 + $0x278] sm:$0xff] }
  0x1c   :  { %7595 = vmatpush3.msra.mxu0 %v62_v20  ;;  %7596 = vmatprep.mubr.msk.f32.mxu0 %vm8337_vm1, %v8336_v0  ;;  %v122_v20 = vld [vmem:[%s9770_s0 + $0x260] sm:$0xff] }
  0x1d   :  { %7602 = vmatpush3.msra.mxu1 %v64_v21  ;;  %7603 = vmatprep.mubr.msk.f32.mxu1 %vm8337_vm1, %v8336_v0  ;;  %v124_v21 = vld [vmem:[%s9770_s0 + $0x270] sm:$0xff] }
  0x1e   :  { %7597 = vmatmul.mubr.msk.f32.vlgmr.msra.gmra.mxu0 %vm179_vm0, %v8418_v5  ;;  %7604 = vmatmul.mubr.msk.f32.vlgmr.msra.gmra.mxu1 %vm179_vm0, %v8418_v5 }
  0x1f   :  { %7606 = vmatprep.subr.mxu0 %v8336_v0  ;;  %7613 = vmatprep.subr.mxu1 %v8336_v0 }
  0x20   :  { %7607 = vmatpush3.msra.mxu0 %v67_v22  ;;  %7614 = vmatpush3.msra.mxu1 %v69_v23  ;;  %v127_v22 = vld [vmem:[%s9770_s0 + $0x288] sm:$0xff]  ;;  %v129_v23 = vld [vmem:[%s9770_s0 + $0x298] sm:$0xff] }
  0x21   :  { %7608 = vmatprep.subr.mxu0 %v8336_v0  ;;  %7615 = vmatprep.subr.mxu1 %v8336_v0 }
  0x22   :  { %7609 = vmatpush3.msra.mxu0 %v66_v24  ;;  %7610 = vmatprep.mubr.msk.f32.mxu0 %vm8337_vm1, %v8336_v0  ;;  %v126_v24 = vld [vmem:[%s9770_s0 + $0x280] sm:$0xff] }
  0x23   :  { %7616 = vmatpush3.msra.mxu1 %v68_v25  ;;  %7617 = vmatprep.mubr.msk.f32.mxu1 %vm8337_vm1, %v8336_v0  ;;  %v128_v25 = vld [vmem:[%s9770_s0 + $0x290] sm:$0xff] }
  0x24   :  { %7611 = vmatmul.mubr.msk.f32.vlgmr.msra.gmra.mxu0 %vm179_vm0, %v8418_v5  ;;  %7618 = vmatmul.mubr.msk.f32.vlgmr.msra.gmra.mxu1 %vm179_vm0, %v8418_v5 }
  0x25   :  { %7620 = vmatprep.subr.mxu0 %v8336_v0  ;;  %7627 = vmatprep.subr.mxu1 %v8336_v0 }
  0x26   :  { %7621 = vmatpush3.msra.mxu0 %v71_v26  ;;  %7628 = vmatpush3.msra.mxu1 %v73_v27  ;;  %v131_v26 = vld [vmem:[%s9770_s0 + $0x2a8] sm:$0xff]  ;;  %v133_v27 = vld [vmem:[%s9770_s0 + $0x2b8] sm:$0xff] }
  0x27   :  { %7622 = vmatprep.subr.mxu0 %v8336_v0  ;;  %7629 = vmatprep.subr.mxu1 %v8336_v0 }
  0x28   :  { %7623 = vmatpush3.msra.mxu0 %v70_v28  ;;  %7624 = vmatprep.mubr.msk.f32.mxu0 %vm8337_vm1, %v8336_v0  ;;  %v130_v28 = vld [vmem:[%s9770_s0 + $0x2a0] sm:$0xff] }
  0x29   :  { %7630 = vmatpush3.msra.mxu1 %v72_v29  ;;  %7631 = vmatprep.mubr.msk.f32.mxu1 %vm8337_vm1, %v8336_v0  ;;  %v132_v29 = vld [vmem:[%s9770_s0 + $0x2b0] sm:$0xff] }
  0x2a   :  { %7625 = vmatmul.mubr.msk.f32.vlgmr.msra.gmra.mxu0 %vm179_vm0, %v8418_v5  ;;  %7632 = vmatmul.mubr.msk.f32.vlgmr.msra.gmra.mxu1 %vm179_vm0, %v8418_v5 }
  0x2b   :  { %7634 = vmatprep.subr.mxu0 %v8336_v0  ;;  %7641 = vmatprep.subr.mxu1 %v8336_v0 }
  0x2c   :  { %7635 = vmatpush3.msra.mxu0 %v75_v30  ;;  %7642 = vmatpush3.msra.mxu1 %v77_v31  ;;  %v43_v30 = vld [vmem:[%s9772_s3 + $0x8] sm:$0xff] }
  0x2d   :  { %7636 = vmatprep.subr.mxu0 %v8336_v0  ;;  %7643 = vmatprep.subr.mxu1 %v8336_v0  ;;  %v135_v31 = vld [vmem:[%s9770_s0 + $0x2c8] sm:$0xff] }
  0x2e   :  { %7637 = vmatpush3.msra.mxu0 %v74_v32  ;;  %7638 = vmatprep.mubr.msk.f32.mxu0 %vm8337_vm1, %v8336_v0  ;;  %v137_v32 = vld [vmem:[%s9770_s0 + $0x2d8] sm:$0xff] }
  0x2f   :  { %7644 = vmatpush3.msra.mxu1 %v76_v33  ;;  %7645 = vmatprep.mubr.msk.f32.mxu1 %vm8337_vm1, %v8336_v0  ;;  %v134_v33 = vld [vmem:[%s9770_s0 + $0x2c0] sm:$0xff] }
  0x30   :  { %7639 = vmatmul.mubr.msk.f32.vlgmr.msra.gmra.mxu0 %vm179_vm0, %v8418_v5  ;;  %7646 = vmatmul.mubr.msk.f32.vlgmr.msra.gmra.mxu1 %vm179_vm0, %v8418_v5 }
  0x31   :  { %7648 = vmatprep.subr.mxu0 %v8336_v0  ;;  %7655 = vmatprep.subr.mxu1 %v8336_v0 }
  0x32   :  { %7649 = vmatpush3.msra.mxu0 %v79_v34  ;;  %7656 = vmatpush3.msra.mxu1 %v81_v35  ;;  %v136_v34 = vld [vmem:[%s9770_s0 + $0x2d0] sm:$0xff]  ;;  %v6684_v35 = vld [vmem:[%s9773_s6 + $0x78] sm:$0xff] }
  0x33   :  { %7650 = vmatprep.subr.mxu0 %v8336_v0  ;;  %7657 = vmatprep.subr.mxu1 %v8336_v0 }
  0x34   :  { %7651 = vmatpush3.msra.mxu0 %v78_v36  ;;  %7652 = vmatprep.mubr.msk.f32.mxu0 %vm8337_vm1, %v8336_v0  ;;  %v139_v36 = vld [vmem:[%s9770_s0 + $0x2e8] sm:$0xff] }
  0x35   :  { %7658 = vmatpush3.msra.mxu1 %v80_v37  ;;  %7659 = vmatprep.mubr.msk.f32.mxu1 %vm8337_vm1, %v8336_v0  ;;  %v141_v37 = vld [vmem:[%s9770_s0 + $0x2f8] sm:$0xff] }
  0x36   :  { %7653 = vmatmul.mubr.msk.f32.vlgmr.msra.gmra.mxu0 %vm179_vm0, %v8418_v5  ;;  %7660 = vmatmul.mubr.msk.f32.vlgmr.msra.gmra.mxu1 %vm179_vm0, %v8418_v5 }
  0x37   :  { %7662 = vmatprep.subr.mxu0 %v8336_v0  ;;  %7669 = vmatprep.subr.mxu1 %v8336_v0 }
  0x38   :  { %7663 = vmatpush3.msra.mxu0 %v83_v38  ;;  %7670 = vmatpush3.msra.mxu1 %v85_v39  ;;  %v138_v38 = vld [vmem:[%s9770_s0 + $0x2e0] sm:$0xff]  ;;  %v140_v39 = vld [vmem:[%s9770_s0 + $0x2f0] sm:$0xff] }
  0x39   :  { %7664 = vmatprep.subr.mxu0 %v8336_v0  ;;  %7671 = vmatprep.subr.mxu1 %v8336_v0 }
  0x3a   :  { %7665 = vmatpush3.msra.mxu0 %v82_v40  ;;  %7666 = vmatprep.mubr.msk.f32.mxu0 %vm8337_vm1, %v8336_v0  ;;  %v6682_v40 = vld [vmem:[%s9773_s6 + $0x68] sm:$0xff] }
  0x3b   :  { %7672 = vmatpush3.msra.mxu1 %v84_v41  ;;  %7673 = vmatprep.mubr.msk.f32.mxu1 %vm8337_vm1, %v8336_v0  ;;  %v143_v41 = vld [vmem:[%s9770_s0 + $0x308] sm:$0xff] }
  0x3c   :  { %7667 = vmatmul.mubr.msk.f32.vlgmr.msra.gmra.mxu0 %vm179_vm0, %v8418_v5  ;;  %7674 = vmatmul.mubr.msk.f32.vlgmr.msra.gmra.mxu1 %vm179_vm0, %v8418_v5 }
  0x3d   :  { %7676 = vmatprep.subr.mxu0 %v8336_v0  ;;  %7683 = vmatprep.subr.mxu1 %v8336_v0 }
  0x3e   :  { %7677 = vmatpush3.msra.mxu0 %v87_v42  ;;  %7684 = vmatpush3.msra.mxu1 %v89_v43  ;;  %v145_v42 = vld [vmem:[%s9770_s0 + $0x318] sm:$0xff]  ;;  %v142_v43 = vld [vmem:[%s9770_s0 + $0x300] sm:$0xff] }
  0x3f   :  { %7678 = vmatprep.subr.mxu0 %v8336_v0  ;;  %7685 = vmatprep.subr.mxu1 %v8336_v0 }
  0x40   :  { %7679 = vmatpush3.msra.mxu0 %v86_v44  ;;  %7680 = vmatprep.mubr.msk.f32.mxu0 %vm8337_vm1, %v8336_v0  ;;  %v144_v44 = vld [vmem:[%s9770_s0 + $0x310] sm:$0xff] }
  0x41   :  { %7686 = vmatpush3.msra.mxu1 %v88_v45  ;;  %7687 = vmatprep.mubr.msk.f32.mxu1 %vm8337_vm1, %v8336_v0  ;;  %v6680_v45 = vld [vmem:[%s9773_s6 + $0x58] sm:$0xff] }
  0x42   :  { %7681 = vmatmul.mubr.msk.f32.vlgmr.msra.gmra.mxu0 %vm179_vm0, %v8418_v5  ;;  %7688 = vmatmul.mubr.msk.f32.vlgmr.msra.gmra.mxu1 %vm179_vm0, %v8418_v5 }
  0x43   :  { %7690 = vmatprep.subr.mxu0 %v8336_v0  ;;  %7697 = vmatprep.subr.mxu1 %v8336_v0 }
  0x44   :  { %7691 = vmatpush3.msra.mxu0 %v91_v46  ;;  %7698 = vmatpush3.msra.mxu1 %v93_v47  ;;  %v147_v46 = vld [vmem:[%s9770_s0 + $0x328] sm:$0xff]  ;;  %v149_v47 = vld [vmem:[%s9770_s0 + $0x338] sm:$0xff] }
  0x45   :  { %7692 = vmatprep.subr.mxu0 %v8336_v0  ;;  %7699 = vmatprep.subr.mxu1 %v8336_v0 }
  0x46   :  { %7693 = vmatpush3.msra.mxu0 %v90_v48  ;;  %7694 = vmatprep.mubr.msk.f32.mxu0 %vm8337_vm1, %v8336_v0  ;;  %v146_v48 = vld [vmem:[%s9770_s0 + $0x320] sm:$0xff] }
  0x47   :  { %7700 = vmatpush3.msra.mxu1 %v92_v49  ;;  %7701 = vmatprep.mubr.msk.f32.mxu1 %vm8337_vm1, %v8336_v0  ;;  %v148_v49 = vld [vmem:[%s9770_s0 + $0x330] sm:$0xff] }
  0x48   :  { %7695 = vmatmul.mubr.msk.f32.vlgmr.msra.gmra.mxu0 %vm179_vm0, %v8418_v5  ;;  %7702 = vmatmul.mubr.msk.f32.vlgmr.msra.gmra.mxu1 %vm179_vm0, %v8418_v5 }
  0x49   :  { %7704 = vmatprep.subr.mxu0 %v8336_v0  ;;  %7711 = vmatprep.subr.mxu1 %v8336_v0 }
  0x4a   :  { %7705 = vmatpush3.msra.mxu0 %v95_v50  ;;  %7712 = vmatpush3.msra.mxu1 %v97_v51  ;;  %v6678_v50 = vld [vmem:[%s9773_s6 + $0x48] sm:$0xff] }
  0x4b   :  { %7706 = vmatprep.subr.mxu0 %v8336_v0  ;;  %7713 = vmatprep.subr.mxu1 %v8336_v0  ;;  %v151_v51 = vld [vmem:[%s9770_s0 + $0x348] sm:$0xff] }
  0x4c   :  { %7707 = vmatpush3.msra.mxu0 %v94_v52  ;;  %7708 = vmatprep.mubr.msk.f32.mxu0 %vm8337_vm1, %v8336_v0  ;;  %v153_v52 = vld [vmem:[%s9770_s0 + $0x358] sm:$0xff] }
  0x4d   :  { %7714 = vmatpush3.msra.mxu1 %v96_v53  ;;  %7715 = vmatprep.mubr.msk.f32.mxu1 %vm8337_vm1, %v8336_v0  ;;  %v150_v53 = vld [vmem:[%s9770_s0 + $0x340] sm:$0xff] }
  0x4e   :  { %7709 = vmatmul.mubr.msk.f32.vlgmr.msra.gmra.mxu0 %vm179_vm0, %v8418_v5  ;;  %7716 = vmatmul.mubr.msk.f32.vlgmr.msra.gmra.mxu1 %vm179_vm0, %v8418_v5 }
  0x4f   :  { %7718 = vmatprep.subr.mxu0 %v8336_v0  ;;  %7725 = vmatprep.subr.mxu1 %v8336_v0 }
  0x50   :  { %7719 = vmatpush3.msra.mxu0 %v99_v54  ;;  %7726 = vmatpush3.msra.mxu1 %v101_v55  ;;  %v152_v54 = vld [vmem:[%s9770_s0 + $0x350] sm:$0xff]  ;;  %v6676_v55 = vld [vmem:[%s9773_s6 + $0x38] sm:$0xff] }
  0x51   :  { %7720 = vmatprep.subr.mxu0 %v8336_v0  ;;  %7727 = vmatprep.subr.mxu1 %v8336_v0 }
  0x52   :  { %7721 = vmatpush3.msra.mxu0 %v98_v56  ;;  %7722 = vmatprep.mubr.msk.f32.mxu0 %vm8337_vm1, %v8336_v0  ;;  %v155_v56 = vld [vmem:[%s9770_s0 + $0x368] sm:$0xff] }
  0x53   :  { %7728 = vmatpush3.msra.mxu1 %v100_v57  ;;  %7729 = vmatprep.mubr.msk.f32.mxu1 %vm8337_vm1, %v8336_v0  ;;  %v157_v57 = vld [vmem:[%s9770_s0 + $0x378] sm:$0xff] }
  0x54   :  { %7723 = vmatmul.mubr.msk.f32.vlgmr.msra.gmra.mxu0 %vm179_vm0, %v8418_v5  ;;  %7730 = vmatmul.mubr.msk.f32.vlgmr.msra.gmra.mxu1 %vm179_vm0, %v8418_v5 }
  0x55   :  { %7732 = vmatprep.subr.mxu0 %v8336_v0  ;;  %7739 = vmatprep.subr.mxu1 %v8336_v0 }
  0x56   :  { %7733 = vmatpush3.msra.mxu0 %v103_v58  ;;  %7740 = vmatpush3.msra.mxu1 %v105_v59  ;;  %v154_v58 = vld [vmem:[%s9770_s0 + $0x360] sm:$0xff]  ;;  %v156_v59 = vld [vmem:[%s9770_s0 + $0x370] sm:$0xff] }
  0x57   :  { %7734 = vmatprep.subr.mxu0 %v8336_v0  ;;  %7741 = vmatprep.subr.mxu1 %v8336_v0 }
  0x58   :  { %7735 = vmatpush3.msra.mxu0 %v102_v60  ;;  %7736 = vmatprep.mubr.msk.f32.mxu0 %vm8337_vm1, %v8336_v0  ;;  %v6674_v60 = vld [vmem:[%s9773_s6 + $0x28] sm:$0xff] }
  0x59   :  { %7742 = vmatpush3.msra.mxu1 %v104_v61  ;;  %7743 = vmatprep.mubr.msk.f32.mxu1 %vm8337_vm1, %v8336_v0  ;;  %v159_v61 = vld [vmem:[%s9770_s0 + $0x388] sm:$0xff] }
  0x5a   :  { %7737 = vmatmul.mubr.msk.f32.vlgmr.msra.gmra.mxu0 %vm179_vm0, %v8418_v5  ;;  %7744 = vmatmul.mubr.msk.f32.vlgmr.msra.gmra.mxu1 %vm179_vm0, %v8418_v5 }
  0x5b   :  { %7746 = vmatprep.subr.mxu0 %v8336_v0  ;;  %7753 = vmatprep.subr.mxu1 %v8336_v0 }
  0x5c   :  { %7747 = vmatpush3.msra.mxu0 %v107_v62  ;;  %7754 = vmatpush3.msra.mxu1 %v109_v63  ;;  %v161_v62 = vld [vmem:[%s9770_s0 + $0x398] sm:$0xff]  ;;  %v158_v63 = vld [vmem:[%s9770_s0 + $0x380] sm:$0xff] }
  0x5d   :  { %7748 = vmatprep.subr.mxu0 %v8336_v0  ;;  %7755 = vmatprep.subr.mxu1 %v8336_v0 }
  0x5e   :  { %7749 = vmatpush3.msra.mxu0 %v106_v1  ;;  %7750 = vmatprep.mubr.msk.f32.mxu0 %vm8337_vm1, %v8336_v0  ;;  %v160_v1 = vld [vmem:[%s9770_s0 + $0x390] sm:$0xff] }
  0x5f   :  { %7756 = vmatpush3.msra.mxu1 %v108_v2  ;;  %7757 = vmatprep.mubr.msk.f32.mxu1 %vm8337_vm1, %v8336_v0  ;;  %v6672_v2 = vld [vmem:[%s9773_s6 + $0x18] sm:$0xff] }
  0x60   :  { %7751 = vmatmul.mubr.msk.f32.vlgmr.msra.gmra.mxu0 %vm179_vm0, %v8418_v5  ;;  %7758 = vmatmul.mubr.msk.f32.vlgmr.msra.gmra.mxu1 %vm179_vm0, %v8418_v5 }
  0x61   :  { %7760 = vmatprep.subr.mxu0 %v8336_v0  ;;  %7767 = vmatprep.subr.mxu1 %v8336_v0 }
  0x62   :  { %7761 = vmatpush3.msra.mxu0 %v111_v3  ;;  %7768 = vmatpush3.msra.mxu1 %v113_v4  ;;  %v163_v3 = vld [vmem:[%s9770_s0 + $0x3a8] sm:$0xff]  ;;  %v165_v4 = vld [vmem:[%s9770_s0 + $0x3b8] sm:$0xff] }
  0x63   :  { %7762 = vmatprep.subr.mxu0 %v8336_v0  ;;  %7769 = vmatprep.subr.mxu1 %v8336_v0 }
  0x64   :  { %7763 = vmatpush3.msra.mxu0 %v110_v6  ;;  %7764 = vmatprep.mubr.msk.f32.mxu0 %vm8337_vm1, %v8336_v0  ;;  %v162_v6 = vld [vmem:[%s9770_s0 + $0x3a0] sm:$0xff] }
  0x65   :  { %7770 = vmatpush3.msra.mxu1 %v112_v7  ;;  %7771 = vmatprep.mubr.msk.f32.mxu1 %vm8337_vm1, %v8336_v0  ;;  %v164_v7 = vld [vmem:[%s9770_s0 + $0x3b0] sm:$0xff] }
  0x66   :  { %7765 = vmatmul.mubr.msk.f32.vlgmr.msra.gmra.mxu0 %vm179_vm0, %v8418_v5  ;;  %7772 = vmatmul.mubr.msk.f32.vlgmr.msra.gmra.mxu1 %vm179_vm0, %v8418_v5 }
  0x67   :  { %7774 = vmatprep.subr.mxu0 %v8336_v0  ;;  %7781 = vmatprep.subr.mxu1 %v8336_v0 }
  0x68   :  { %7775 = vmatpush3.msra.mxu0 %v115_v8  ;;  %7782 = vmatpush3.msra.mxu1 %v117_v9  ;;  %v6670_v8 = vld [vmem:[%s9773_s6 + $0x8] sm:$0xff] }
  0x69   :  { %7776 = vmatprep.subr.mxu0 %v8336_v0  ;;  %7783 = vmatprep.subr.mxu1 %v8336_v0  ;;  %v167_v9 = vld [vmem:[%s9770_s0 + $0x3c8] sm:$0xff] }
  0x6a   :  { %7777 = vmatpush3.msra.mxu0 %v114_v10  ;;  %7778 = vmatprep.mubr.msk.f32.mxu0 %vm8337_vm1, %v8336_v0  ;;  %v169_v10 = vld [vmem:[%s9770_s0 + $0x3d8] sm:$0xff] }
  0x6b   :  { %7784 = vmatpush3.msra.mxu1 %v116_v11  ;;  %7785 = vmatprep.mubr.msk.f32.mxu1 %vm8337_vm1, %v8336_v0  ;;  %v166_v11 = vld [vmem:[%s9770_s0 + $0x3c0] sm:$0xff] }
  0x6c   :  { %8333 = vset.pattern.permute.xlu0 %v8338_v13  ;;  %7779 = vmatmul.mubr.msk.f32.vlgmr.msra.gmra.mxu0 %vm179_vm0, %v8418_v5 }
  0x6d   :  { %7786 = vmatmul.mubr.msk.f32.vlgmr.msra.gmra.mxu1 %vm179_vm0, %v8418_v5  ;;  %7788 = vmatprep.subr.mxu0 %v8336_v0 }
  0x6e   :  { %7795 = vmatprep.subr.mxu1 %v8336_v0  ;;  %176 = vperm.xlu0 %8333, %v42_v12   ;;  %v168_v12 = vld [vmem:[%s9770_s0 + $0x3d0] sm:$0xff] }
  0x6f   :  { %7789 = vmatpush3.msra.mxu0 %v119_v14  ;;  %7796 = vmatpush3.msra.mxu1 %v121_v15  ;;  %v8335_v14 = vld [vmem:[%s9771_s2] sm:$0xff]  ;;  %v171_v15 = vld [vmem:[%s9770_s0 + $0x3e8] sm:$0xff] }
  0x70   :  { %7790 = vmatprep.subr.mxu0 %v8336_v0  ;;  %7797 = vmatprep.subr.mxu1 %v8336_v0 }
  0x71   :  { %7791 = vmatpush3.msra.mxu0 %v118_v16  ;;  %7792 = vmatprep.mubr.msk.f32.mxu0 %vm8337_vm1, %v8336_v0  ;;  %v173_v16 = vld [vmem:[%s9770_s0 + $0x3f8] sm:$0xff] }
  0x72   :  { %7798 = vmatpush3.msra.mxu1 %v120_v17  ;;  %7799 = vmatprep.mubr.msk.f32.mxu1 %vm8337_vm1, %v8336_v0  ;;  %v170_v17 = vld [vmem:[%s9770_s0 + $0x3e0] sm:$0xff] }
  0x73   :  { %7793 = vmatmul.mubr.msk.f32.vlgmr.msra.gmra.mxu0 %vm179_vm0, %v8418_v5  ;;  %7800 = vmatmul.mubr.msk.f32.vlgmr.msra.gmra.mxu1 %vm179_vm0, %v8418_v5 }
  0x74   :  { %7802 = vmatprep.subr.mxu0 %v8336_v0  ;;  %7809 = vmatprep.subr.mxu1 %v8336_v0 }
  0x75   :  { %7803 = vmatpush3.msra.mxu0 %v123_v18  ;;  %7810 = vmatpush3.msra.mxu1 %v125_v19  ;;  %v172_v18 = vld [vmem:[%s9770_s0 + $0x3f0] sm:$0xff]  ;;  %v6810_v19 = vld [vmem:[%s9774_s8 + $0x28] sm:$0xff] }
  0x76   :  { %7804 = vmatprep.subr.mxu0 %v8336_v0  ;;  %7811 = vmatprep.subr.mxu1 %v8336_v0 }
  0x77   :  { %7805 = vmatpush3.msra.mxu0 %v122_v20  ;;  %7806 = vmatprep.mubr.msk.f32.mxu0 %vm8337_vm1, %v8336_v0 }
  0x78   :  { %7812 = vmatpush3.msra.mxu1 %v124_v21  ;;  %7813 = vmatprep.mubr.msk.f32.mxu1 %vm8337_vm1, %v8336_v0 }
  0x79   :  { %7807 = vmatmul.mubr.msk.f32.vlgmr.msra.gmra.mxu0 %vm179_vm0, %v8418_v5  ;;  %7814 = vmatmul.mubr.msk.f32.vlgmr.msra.gmra.mxu1 %vm179_vm0, %v8418_v5 }
  0x7a   :  { %7816 = vmatprep.subr.mxu0 %v8336_v0  ;;  %7823 = vmatprep.subr.mxu1 %v8336_v0 }
  0x7b   :  { %7817 = vmatpush3.msra.mxu0 %v127_v22  ;;  %7824 = vmatpush3.msra.mxu1 %v129_v23  ;;  %v6808_v22 = vld [vmem:[%s9774_s8 + $0x18] sm:$0xff] }
  0x7c   :  { %7818 = vmatprep.subr.mxu0 %v8336_v0  ;;  %7825 = vmatprep.subr.mxu1 %v8336_v0 }
  0x7d   :  { %7819 = vmatpush3.msra.mxu0 %v126_v24  ;;  %7820 = vmatprep.mubr.msk.f32.mxu0 %vm8337_vm1, %v8336_v0 }
  0x7e   :  { %7826 = vmatpush3.msra.mxu1 %v128_v25  ;;  %7827 = vmatprep.mubr.msk.f32.mxu1 %vm8337_vm1, %v8336_v0  ;;  %v6806_v25 = vld [vmem:[%s9774_s8 + $0x8] sm:$0xff] }
  0x7f   :  { %7821 = vmatmul.mubr.msk.f32.vlgmr.msra.gmra.mxu0 %vm179_vm0, %v8418_v5  ;;  %7828 = vmatmul.mubr.msk.f32.vlgmr.msra.gmra.mxu1 %vm179_vm0, %v8418_v5 }
  0x80   :  { %7830 = vmatprep.subr.mxu0 %v8336_v0  ;;  %7837 = vmatprep.subr.mxu1 %v8336_v0 }
  0x81   :  { %7831 = vmatpush3.msra.mxu0 %v131_v26  ;;  %7838 = vmatpush3.msra.mxu1 %v133_v27 }
  0x82   :  { %7832 = vmatprep.subr.mxu0 %v8336_v0  ;;  %7839 = vmatprep.subr.mxu1 %v8336_v0 }
  0x83   :  { %7833 = vmatpush3.msra.mxu0 %v130_v28  ;;  %7834 = vmatprep.mubr.msk.f32.mxu0 %vm8337_vm1, %v8336_v0 }
  0x84   :  { %7840 = vmatpush3.msra.mxu1 %v132_v29  ;;  %7841 = vmatprep.mubr.msk.f32.mxu1 %vm8337_vm1, %v8336_v0 }
  0x85   :  { %7835 = vmatmul.mubr.msk.f32.vlgmr.msra.gmra.mxu0 %vm179_vm0, %v8418_v5  ;;  %7842 = vmatmul.mubr.msk.f32.vlgmr.msra.gmra.mxu1 %vm179_vm0, %v8418_v5 }
  0x86   :  { %7844 = vmatprep.subr.mxu0 %v8336_v0  ;;  %7851 = vmatprep.subr.mxu1 %v8336_v0 }
  0x87   :  { %4729 = vperm.xlu0 %8333, %v43_v30   ;;  %7845 = vmatpush3.msra.mxu0 %v135_v31  ;;  %v6967_v30 = vld [vmem:[%s9775_s10] sm:$0x3] }
  0x88   :  { %7852 = vmatpush3.msra.mxu1 %v137_v32  ;;  %7846 = vmatprep.subr.mxu0 %v8336_v0 }
  0x89   :  { %7853 = vmatprep.subr.mxu1 %v8336_v0  ;;  %7847 = vmatpush3.msra.mxu0 %v134_v33 }
  0x8a   :  { %7848 = vmatprep.mubr.msk.f32.mxu0 %vm8337_vm1, %v8336_v0  ;;  %7854 = vmatpush3.msra.mxu1 %v136_v34 }
  0x8b   :  { %7855 = vmatprep.mubr.msk.f32.mxu1 %vm8337_vm1, %v8336_v0  ;;  %7849 = vmatmul.mubr.msk.f32.vlgmr.msra.gmra.mxu0 %vm179_vm0, %v8418_v5 }
  0x8c   :  { %7856 = vmatmul.mubr.msk.f32.vlgmr.msra.gmra.mxu1 %vm179_vm0, %v8418_v5  ;;  %7858 = vmatprep.subr.mxu0 %v8336_v0 }
  0x8d   :  { %7865 = vmatprep.subr.mxu1 %v8336_v0  ;;  %6762 = vperm.xlu0 %8333, %v6684_v35  }
  0x8e   :  { %7859 = vmatpush3.msra.mxu0 %v139_v36  ;;  %7866 = vmatpush3.msra.mxu1 %v141_v37 }
  0x8f   :  { %7860 = vmatprep.subr.mxu0 %v8336_v0  ;;  %7867 = vmatprep.subr.mxu1 %v8336_v0 }
  0x90   :  { %7861 = vmatpush3.msra.mxu0 %v138_v38  ;;  %7862 = vmatprep.mubr.msk.f32.mxu0 %vm8337_vm1, %v8336_v0 }
  0x91   :  { %7868 = vmatpush3.msra.mxu1 %v140_v39  ;;  %7869 = vmatprep.mubr.msk.f32.mxu1 %vm8337_vm1, %v8336_v0 }
  0x92   :  { %7863 = vmatmul.mubr.msk.f32.vlgmr.msra.gmra.mxu0 %vm179_vm0, %v8418_v5  ;;  %7870 = vmatmul.mubr.msk.f32.vlgmr.msra.gmra.mxu1 %vm179_vm0, %v8418_v5 }
  0x93   :  { %7872 = vmatprep.subr.mxu0 %v8336_v0  ;;  %7879 = vmatprep.subr.mxu1 %v8336_v0 }
  0x94   :  { %6752 = vperm.xlu0 %8333, %v6682_v40   ;;  %7873 = vmatpush3.msra.mxu0 %v143_v41 }
  0x95   :  { %7880 = vmatpush3.msra.mxu1 %v145_v42  ;;  %7874 = vmatprep.subr.mxu0 %v8336_v0 }
  0x96   :  { %7881 = vmatprep.subr.mxu1 %v8336_v0  ;;  %7875 = vmatpush3.msra.mxu0 %v142_v43 }
  0x97   :  { %7876 = vmatprep.mubr.msk.f32.mxu0 %vm8337_vm1, %v8336_v0  ;;  %7882 = vmatpush3.msra.mxu1 %v144_v44 }
  0x98   :  { %7883 = vmatprep.mubr.msk.f32.mxu1 %vm8337_vm1, %v8336_v0  ;;  %7877 = vmatmul.mubr.msk.f32.vlgmr.msra.gmra.mxu0 %vm179_vm0, %v8418_v5 }
  0x99   :  { %7884 = vmatmul.mubr.msk.f32.vlgmr.msra.gmra.mxu1 %vm179_vm0, %v8418_v5  ;;  %7886 = vmatprep.subr.mxu0 %v8336_v0 }
  0x9a   :  { %7893 = vmatprep.subr.mxu1 %v8336_v0  ;;  %6742 = vperm.xlu0 %8333, %v6680_v45  }
  0x9b   :  { %7887 = vmatpush3.msra.mxu0 %v147_v46  ;;  %7894 = vmatpush3.msra.mxu1 %v149_v47 }
  0x9c   :  { %7888 = vmatprep.subr.mxu0 %v8336_v0  ;;  %7895 = vmatprep.subr.mxu1 %v8336_v0 }
  0x9d   :  { %7889 = vmatpush3.msra.mxu0 %v146_v48  ;;  %7890 = vmatprep.mubr.msk.f32.mxu0 %vm8337_vm1, %v8336_v0 }
  0x9e   :  { %7896 = vmatpush3.msra.mxu1 %v148_v49  ;;  %7897 = vmatprep.mubr.msk.f32.mxu1 %vm8337_vm1, %v8336_v0 }
  0x9f   :  { %7891 = vmatmul.mubr.msk.f32.vlgmr.msra.gmra.mxu0 %vm179_vm0, %v8418_v5  ;;  %7898 = vmatmul.mubr.msk.f32.vlgmr.msra.gmra.mxu1 %vm179_vm0, %v8418_v5 }
  0xa0   :  { %7900 = vmatprep.subr.mxu0 %v8336_v0  ;;  %7907 = vmatprep.subr.mxu1 %v8336_v0 }
  0xa1   :  { %6732 = vperm.xlu0 %8333, %v6678_v50   ;;  %7901 = vmatpush3.msra.mxu0 %v151_v51 }
  0xa2   :  { %7908 = vmatpush3.msra.mxu1 %v153_v52  ;;  %7902 = vmatprep.subr.mxu0 %v8336_v0 }
  0xa3   :  { %7909 = vmatprep.subr.mxu1 %v8336_v0  ;;  %7903 = vmatpush3.msra.mxu0 %v150_v53 }
  0xa4   :  { %7904 = vmatprep.mubr.msk.f32.mxu0 %vm8337_vm1, %v8336_v0  ;;  %7910 = vmatpush3.msra.mxu1 %v152_v54 }
  0xa5   :  { %7911 = vmatprep.mubr.msk.f32.mxu1 %vm8337_vm1, %v8336_v0  ;;  %7905 = vmatmul.mubr.msk.f32.vlgmr.msra.gmra.mxu0 %vm179_vm0, %v8418_v5 }
  0xa6   :  { %7912 = vmatmul.mubr.msk.f32.vlgmr.msra.gmra.mxu1 %vm179_vm0, %v8418_v5  ;;  %7914 = vmatprep.subr.mxu0 %v8336_v0 }
  0xa7   :  { %7921 = vmatprep.subr.mxu1 %v8336_v0  ;;  %6722 = vperm.xlu0 %8333, %v6676_v55  }
  0xa8   :  { %7915 = vmatpush3.msra.mxu0 %v155_v56  ;;  %7922 = vmatpush3.msra.mxu1 %v157_v57 }
  0xa9   :  { %7916 = vmatprep.subr.mxu0 %v8336_v0  ;;  %7923 = vmatprep.subr.mxu1 %v8336_v0 }
  0xaa   :  { %7917 = vmatpush3.msra.mxu0 %v154_v58  ;;  %7918 = vmatprep.mubr.msk.f32.mxu0 %vm8337_vm1, %v8336_v0 }
  0xab   :  { %7924 = vmatpush3.msra.mxu1 %v156_v59  ;;  %7925 = vmatprep.mubr.msk.f32.mxu1 %vm8337_vm1, %v8336_v0 }
  0xac   :  { %7919 = vmatmul.mubr.msk.f32.vlgmr.msra.gmra.mxu0 %vm179_vm0, %v8418_v5  ;;  %7926 = vmatmul.mubr.msk.f32.vlgmr.msra.gmra.mxu1 %vm179_vm0, %v8418_v5 }
  0xad   :  { %7928 = vmatprep.subr.mxu0 %v8336_v0  ;;  %7935 = vmatprep.subr.mxu1 %v8336_v0 }
  0xae   :  { %6712 = vperm.xlu0 %8333, %v6674_v60   ;;  %7929 = vmatpush3.msra.mxu0 %v159_v61 }
  0xaf   :  { %7936 = vmatpush3.msra.mxu1 %v161_v62  ;;  %7930 = vmatprep.subr.mxu0 %v8336_v0 }
  0xb0   :  { %7937 = vmatprep.subr.mxu1 %v8336_v0  ;;  %7931 = vmatpush3.msra.mxu0 %v158_v63 }
  0xb1   :  { %7932 = vmatprep.mubr.msk.f32.mxu0 %vm8337_vm1, %v8336_v0  ;;  %7938 = vmatpush3.msra.mxu1 %v160_v1 }
  0xb2   :  { %7939 = vmatprep.mubr.msk.f32.mxu1 %vm8337_vm1, %v8336_v0  ;;  %7933 = vmatmul.mubr.msk.f32.vlgmr.msra.gmra.mxu0 %vm179_vm0, %v8418_v5 }
  0xb3   :  { %7940 = vmatmul.mubr.msk.f32.vlgmr.msra.gmra.mxu1 %vm179_vm0, %v8418_v5  ;;  %7942 = vmatprep.subr.mxu0 %v8336_v0 }
  0xb4   :  { %7949 = vmatprep.subr.mxu1 %v8336_v0  ;;  %6702 = vperm.xlu0 %8333, %v6672_v2  }
  0xb5   :  { %7943 = vmatpush3.msra.mxu0 %v163_v3  ;;  %7950 = vmatpush3.msra.mxu1 %v165_v4 }
  0xb6   :  { %7944 = vmatprep.subr.mxu0 %v8336_v0  ;;  %7951 = vmatprep.subr.mxu1 %v8336_v0 }
  0xb7   :  { %7945 = vmatpush3.msra.mxu0 %v162_v6  ;;  %7946 = vmatprep.mubr.msk.f32.mxu0 %vm8337_vm1, %v8336_v0 }
  0xb8   :  { %7952 = vmatpush3.msra.mxu1 %v164_v7  ;;  %7953 = vmatprep.mubr.msk.f32.mxu1 %vm8337_vm1, %v8336_v0 }
  0xb9   :  { %7947 = vmatmul.mubr.msk.f32.vlgmr.msra.gmra.mxu0 %vm179_vm0, %v8418_v5  ;;  %7954 = vmatmul.mubr.msk.f32.vlgmr.msra.gmra.mxu1 %vm179_vm0, %v8418_v5  ;;  %v6812_v5 = vld [vmem:[%s9774_s8 + $0x38] sm:$0xff] }
  0xba   :  { %7956 = vmatprep.subr.mxu0 %v8336_v0  ;;  %7963 = vmatprep.subr.mxu1 %v8336_v0 }
  0xbb   :  { %6692 = vperm.xlu0 %8333, %v6670_v8   ;;  %7957 = vmatpush3.msra.mxu0 %v167_v9 }
  0xbc   :  { %7964 = vmatpush3.msra.mxu1 %v169_v10  ;;  %7958 = vmatprep.subr.mxu0 %v8336_v0 }
  0xbd   :  { %7965 = vmatprep.subr.mxu1 %v8336_v0  ;;  %7959 = vmatpush3.msra.mxu0 %v166_v11 }
  0xbe   :  { %7960 = vmatprep.mubr.msk.f32.mxu0 %vm8337_vm1, %v8336_v0  ;;  %7966 = vmatpush3.msra.mxu1 %v168_v12 }
  0xbf   :  { %7967 = vmatprep.mubr.msk.f32.mxu1 %vm8337_vm1, %v8336_v0  ;;  %7961 = vmatmul.mubr.msk.f32.vlgmr.msra.gmra.mxu0 %vm179_vm0, %v8335_v14 }
  0xc0   :  { %7968 = vmatmul.mubr.msk.f32.vlgmr.msra.gmra.mxu1 %vm179_vm0, %v8335_v14  ;;  %7970 = vmatprep.subr.mxu0 %v8336_v0 }
  0xc1   :  { %7977 = vmatprep.subr.mxu1 %v8336_v0  ;;  %6850 = vperm.xlu0 %8333, %v6812_v5   ;;  %v9250_v5 = vld [vmem:[%s9771_s2 + $0x8] sm:$0xff] }
  0xc2   :  { %7971 = vmatpush3.msra.mxu0 %v171_v15  ;;  %7978 = vmatpush3.msra.mxu1 %v173_v16 }
  0xc3   :  { %7972 = vmatprep.subr.mxu0 %v8336_v0  ;;  %7979 = vmatprep.subr.mxu1 %v8336_v0 }
  0xc4   :  { %7973 = vmatpush3.msra.mxu0 %v170_v17  ;;  %7974 = vmatprep.mubr.msk.f32.mxu0 %vm8337_vm1, %v8336_v0 }
  0xc5   :  { %7980 = vmatpush3.msra.mxu1 %v172_v18  ;;  %7981 = vmatprep.mubr.msk.f32.mxu1 %vm8337_vm1, %v8336_v0 }
  0xc6   :  { %7975 = vmatmul.mubr.msk.f32.vlgmr.msra.gmra.mxu0 %vm179_vm0, %v8335_v14  ;;  %7982 = vmatmul.mubr.msk.f32.vlgmr.msra.gmra.mxu1 %vm179_vm0, %v8335_v14  ;;  %v249_v20 = vpop.f32.mrf.mxu0  ;;  %v319_v21 = vpop.f32.mrf.mxu1 }
  0xc7   :  { %6840 = vperm.xlu0 %8333, %v6810_v19   ;;  %7984 = vmatprep.subr.mxu0 %v8336_v0 }
  0xc8   :  { %v7542_v23 = vpop.f32.mrf.mxu0  ;;  %v7549_v24 = vpop.f32.mrf.mxu1  ;;  %7995 = vmatprep.subr.mxu1 %v8336_v0  ;;  %7992 = vmatprep.mubr.msk.f32.mxu0 %vm8337_vm1, %v8336_v0 }
  0xc9   :  { %8003 = vmatprep.mubr.msk.f32.mxu1 %vm8337_vm1, %v8336_v0  ;;  %8334 = vset.pattern.permute.xlu1 %v8338_v13 }
  0xcb   :  { %6830 = vperm.xlu0 %8333, %v6808_v22  }
  0xcc   :  { %v389_v26 = vpop.f32.mrf.mxu0  ;;  %v459_v27 = vpop.f32.mrf.mxu1 }
  0xce   :  { %v7556_v28 = vpop.f32.mrf.mxu0  ;;  %v7563_v29 = vpop.f32.mrf.mxu1 }
  0xcf   :  { %6820 = vperm.xlu0 %8333, %v6806_v25  }
  0xd2   :  { %v9224_v31 = vpop.f32.mrf.mxu0  ;;  %v599_v32 = vpop.f32.mrf.mxu1 }
  0xd3   :  { %6970 = vperm.xlu0 %8333, %v6967_v30  }
  0xd4   :  { %v7570_v33 = vpop.f32.mrf.mxu0  ;;  %v7577_v13 = vpop.f32.mrf.mxu1 }
  0xd8   :  { %v9226_v34 = vpop.f32.mrf.mxu0  ;;  %v9228_v35 = vpop.f32.mrf.mxu1 }
  0xda   :  { %v7584_v36 = vpop.f32.mrf.mxu0  ;;  %v7591_v37 = vpop.f32.mrf.mxu1 }
  0xde   :  { %v809_v38 = vpop.f32.mrf.mxu0  ;;  %v879_v39 = vpop.f32.mrf.mxu1 }
  0xe0   :  { %v7598_v40 = vpop.f32.mrf.mxu0  ;;  %v7605_v41 = vpop.f32.mrf.mxu1 }
  0xe4   :  { %v949_v42 = vpop.f32.mrf.mxu0  ;;  %v1019_v43 = vpop.f32.mrf.mxu1 }
  0xe6   :  { %v7612_v44 = vpop.f32.mrf.mxu0  ;;  %v7619_v45 = vpop.f32.mrf.mxu1 }
  0xe9   :  { %v9230_v48 = vpop.permute.xlu0 %176 }
  0xea   :  { %v1089_v46 = vpop.f32.mrf.mxu0  ;;  %v1159_v47 = vpop.f32.mrf.mxu1  ;;  %v810_v51 = vadd.f32 %v809_v38, %v9230_v48  ;;  %v880_v52 = vadd.f32 %v879_v39, %v9230_v48  ;;  %v950_v53 = vadd.f32 %v949_v42, %v9230_v48  ;;  %v1020_v54 = vadd.f32 %v1019_v43, %v9230_v48 }
  0xeb   :  { %v320_v55 = vadd.f32 %v319_v21, %v9230_v48  ;;  %v460_v56 = vadd.f32 %v459_v27, %v9230_v48  ;;  %v250_v63 = vadd.f32 %v249_v20, %v9230_v48  ;;  %v390_v1 = vadd.f32 %v389_v26, %v9230_v48 }
  0xec   :  { %v7626_v49 = vpop.f32.mrf.mxu0  ;;  %v7633_v50 = vpop.f32.mrf.mxu1  ;;  %v4671_v57 = vmax.f32 %v810_v51, 0.0  ;;  %v4672_v58 = vmax.f32 %v880_v52, 0.0  ;;  %v4673_v59 = vmax.f32 %v950_v53, 0.0  ;;  %v4674_v60 = vmax.f32 %v1020_v54, 0.0 }
  0xed   :  { %v1160_v2 = vadd.f32 %v1159_v47, %v9230_v48  ;;  %v4664_v6 = vmax.f32 %v320_v55, 0.0  ;;  %v4666_v7 = vmax.f32 %v460_v56, 0.0  ;;  %v1090_v8 = vadd.f32 %v1089_v46, %v9230_v48 }
  0xee   :  { %7985 = vmatpush3.msra.mxu0 %v4672_v58  ;;  %7996 = vmatpush3.msra.mxu1 %v4674_v60  ;;  %v4663_v10 = vmax.f32 %v250_v63, 0.0  ;;  %v4665_v11 = vmax.f32 %v390_v1, 0.0  ;;  %v600_v17 = vadd.f32 %v599_v32, %v9230_v48  ;;  %v530_v22 = vadd.f32 %v9224_v31, %v9230_v48 }
  0xef   :  { %7986 = vmatprep.subr.mxu0 %v8336_v0  ;;  %7997 = vmatprep.subr.mxu1 %v8336_v0  ;;  %v4676_v12 = vmax.f32 %v1160_v2, 0.0  ;;  %v4675_v18 = vmax.f32 %v1090_v8, 0.0  ;;  %v740_v23 = vadd.f32 %v9228_v35, %v9230_v48  ;;  %v670_v28 = vadd.f32 %v9226_v34, %v9230_v48 }
  0xf0   :  { %v1229_v61 = vpop.f32.mrf.mxu0  ;;  %v1299_v62 = vpop.f32.mrf.mxu1  ;;  %7987 = vmatpush3.msra.mxu0 %v4671_v57  ;;  %7998 = vmatpush3.msra.mxu1 %v4673_v59  ;;  %v4668_v25 = vmax.f32 %v600_v17, 0.0  ;;  %v4667_v29 = vmax.f32 %v530_v22, 0.0 }
  0xf1   :  { %v1300_v9 = vadd.f32 %v1299_v62, %v9230_v48  ;;  %7988 = vmatprep.subr.mxu0 %v8336_v0  ;;  %7999 = vmatprep.subr.mxu1 %v8336_v0  ;;  %v1230_v16 = vadd.f32 %v1229_v61, %v9230_v48  ;;  %v4670_v32 = vmax.f32 %v740_v23, 0.0  ;;  %v4669_v33 = vmax.f32 %v670_v28, 0.0 }
  0xf2   :  { %v7640_v3 = vpop.f32.mrf.mxu0  ;;  %v7647_v4 = vpop.f32.mrf.mxu1  ;;  %7989 = vmatpush3.msra.mxu0 %v4664_v6  ;;  %8000 = vmatpush3.msra.mxu1 %v4666_v7 }
  0xf3   :  { %7990 = vmatprep.subr.mxu0 %v8336_v0  ;;  %8001 = vmatprep.subr.mxu1 %v8336_v0  ;;  %v4678_v19 = vmax.f32 %v1300_v9, 0.0  ;;  %v4677_v24 = vmax.f32 %v1230_v16, 0.0 }
  0xf4   :  { %7991 = vmatpush3.msra.mxu0 %v4663_v10  ;;  %8002 = vmatpush3.msra.mxu1 %v4665_v11 }
  0xf5   :  { %7993 = vmatmul.mubr.msk.f32.vlgmr.msra.gmra.mxu0 %vm4732_vm2, %v9250_v5  ;;  %8006 = vmatprep.subr.mxu0 %v8336_v0 }
  0xf6   :  { %v9252_v14 = vpop.f32.mrf.mxu0  ;;  %v9254_v15 = vpop.f32.mrf.mxu1  ;;  %8007 = vmatpush3.msra.mxu0 %v4676_v12  ;;  %8004 = vmatmul.mubr.msk.f32.vlgmr.msra.gmra.mxu1 %vm4732_vm2, %v9250_v5 }
  0xf7   :  { %8008 = vmatprep.subr.mxu0 %v8336_v0  ;;  %8017 = vmatprep.subr.mxu1 %v8336_v0  ;;  %v1440_v47 = vadd.f32 %v9254_v15, %v9230_v48  ;;  %v1370_v51 = vadd.f32 %v9252_v14, %v9230_v48 }
  0xf8   :  { %v7654_v20 = vpop.f32.mrf.mxu0  ;;  %v7661_v21 = vpop.f32.mrf.mxu1  ;;  %8009 = vmatpush3.msra.mxu0 %v4675_v18  ;;  %8018 = vmatpush3.msra.mxu1 %v4678_v19 }
  0xf9   :  { %8010 = vmatprep.subr.mxu0 %v8336_v0  ;;  %8019 = vmatprep.subr.mxu1 %v8336_v0  ;;  %v4680_v54 = vmax.f32 %v1440_v47, 0.0  ;;  %v4679_v59 = vmax.f32 %v1370_v51, 0.0 }
  0xfa   :  { %8011 = vmatpush3.msra.mxu0 %v4668_v25  ;;  %8014 = vmatprep.mubr.msk.f32.mxu0 %vm8337_vm1, %v8336_v0 }
  0xfb   :  { %8012 = vmatprep.subr.mxu0 %v8336_v0  ;;  %8020 = vmatpush3.msra.mxu1 %v4677_v24 }
  0xfc   :  { %v1509_v26 = vpop.f32.mrf.mxu0  ;;  %v1579_v27 = vpop.f32.mrf.mxu1  ;;  %8013 = vmatpush3.msra.mxu0 %v4667_v29  ;;  %8021 = vmatprep.subr.mxu1 %v8336_v0 }
  0xfd   :  { %8015 = vmatmul.mubr.msk.f32.vlgmr.msra.gmra.mxu0 %vm4732_vm2, %v9250_v5  ;;  %8022 = vmatpush3.msra.mxu1 %v4670_v32  ;;  %v1580_v60 = vadd.f32 %v1579_v27, %v9230_v48  ;;  %v1510_v63 = vadd.f32 %v1509_v26, %v9230_v48 }
  0xfe   :  { %v7668_v30 = vpop.f32.mrf.mxu0  ;;  %v7675_v31 = vpop.f32.mrf.mxu1  ;;  %8023 = vmatprep.subr.mxu1 %v8336_v0  ;;  %8025 = vmatprep.mubr.msk.f32.mxu1 %vm8337_vm1, %v8336_v0 }
  0xff   :  { %8024 = vmatpush3.msra.mxu1 %v4669_v33  ;;  %8028 = vmatprep.subr.mxu0 %v8336_v0  ;;  %v4682_v3 = vmax.f32 %v1580_v60, 0.0  ;;  %v4681_v8 = vmax.f32 %v1510_v63, 0.0 }
 0x100   :  { %8026 = vmatmul.mubr.msk.f32.vlgmr.msra.gmra.mxu1 %vm4732_vm2, %v9250_v5  ;;  %8039 = vmatprep.subr.mxu1 %v8336_v0 }
 0x101   :  { %8036 = vmatprep.mubr.msk.f32.mxu0 %vm8337_vm1, %v8336_v0  ;;  %8047 = vmatprep.mubr.msk.f32.mxu1 %vm8337_vm1, %v8336_v0 }
 0x102   :  { %v9284_v13 = vpop.f32.mrf.mxu0  ;;  %v1719_v34 = vpop.f32.mrf.mxu1 }
 0x103   :  { %v1720_v9 = vadd.f32 %v1719_v34, %v9230_v48  ;;  %v1650_v14 = vadd.f32 %v9284_v13, %v9230_v48 }
 0x104   :  { %v7682_v35 = vpop.f32.mrf.mxu0  ;;  %v7689_v36 = vpop.f32.mrf.mxu1 }
 0x105   :  { %v4684_v17 = vmax.f32 %v1720_v9, 0.0  ;;  %v4683_v21 = vmax.f32 %v1650_v14, 0.0 }
 0x108   :  { %v9294_v37 = vpop.f32.mrf.mxu0  ;;  %v9296_v38 = vpop.f32.mrf.mxu1 }
 0x109   :  { %v1860_v22 = vadd.f32 %v9296_v38, %v9230_v48  ;;  %v1790_v26 = vadd.f32 %v9294_v37, %v9230_v48 }
 0x10a   :  { %v7696_v39 = vpop.f32.mrf.mxu0  ;;  %v7703_v40 = vpop.f32.mrf.mxu1 }
 0x10b   :  { %v4686_v29 = vmax.f32 %v1860_v22, 0.0  ;;  %v4685_v32 = vmax.f32 %v1790_v26, 0.0 }
 0x10e   :  { %v1929_v41 = vpop.f32.mrf.mxu0  ;;  %v1999_v42 = vpop.f32.mrf.mxu1 }
 0x10f   :  { %v1930_v43 = vadd.f32 %v1929_v41, %v9230_v48  ;;  %v2000_v44 = vadd.f32 %v1999_v42, %v9230_v48 }
 0x110   :  { %v7710_v45 = vpop.f32.mrf.mxu0  ;;  %v7717_v46 = vpop.f32.mrf.mxu1 }
 0x111   :  { %v4687_v49 = vmax.f32 %v1930_v43, 0.0  ;;  %v4688_v50 = vmax.f32 %v2000_v44, 0.0 }
 0x113   :  { %8029 = vmatpush3.msra.mxu0 %v4688_v50 }
 0x114   :  { %v2069_v52 = vpop.f32.mrf.mxu0  ;;  %v2139_v53 = vpop.f32.mrf.mxu1  ;;  %8030 = vmatprep.subr.mxu0 %v8336_v0 }
 0x115   :  { %v2070_v55 = vadd.f32 %v2069_v52, %v9230_v48  ;;  %v2140_v56 = vadd.f32 %v2139_v53, %v9230_v48  ;;  %8031 = vmatpush3.msra.mxu0 %v4687_v49 }
 0x116   :  { %v7724_v57 = vpop.f32.mrf.mxu0  ;;  %v7731_v58 = vpop.f32.mrf.mxu1  ;;  %8032 = vmatprep.subr.mxu0 %v8336_v0 }
 0x117   :  { %v4689_v61 = vmax.f32 %v2070_v55, 0.0  ;;  %v4690_v62 = vmax.f32 %v2140_v56, 0.0  ;;  %8033 = vmatpush3.msra.mxu0 %v4680_v54 }
 0x118   :  { %8034 = vmatprep.subr.mxu0 %v8336_v0 }
 0x119   :  { %8040 = vmatpush3.msra.mxu1 %v4690_v62  ;;  %8035 = vmatpush3.msra.mxu0 %v4679_v59 }
 0x11a   :  { %v2209_v1 = vpop.f32.mrf.mxu0  ;;  %v2279_v2 = vpop.f32.mrf.mxu1  ;;  %8041 = vmatprep.subr.mxu1 %v8336_v0  ;;  %8037 = vmatmul.mubr.msk.f32.vlgmr.msra.gmra.mxu0 %vm4732_vm2, %v9250_v5 }
 0x11b   :  { %v2210_v4 = vadd.f32 %v2209_v1, %v9230_v48  ;;  %v2280_v6 = vadd.f32 %v2279_v2, %v9230_v48  ;;  %8042 = vmatpush3.msra.mxu1 %v4689_v61  ;;  %8050 = vmatprep.subr.mxu0 %v8336_v0 }
 0x11c   :  { %v7738_v7 = vpop.f32.mrf.mxu0  ;;  %8043 = vmatprep.subr.mxu1 %v8336_v0  ;;  %8058 = vmatprep.mubr.msk.f32.mxu0 %vm8337_vm1, %v8336_v0  ;;  %v7745_v12 = vpop.f32.mrf.mxu1 }
 0x11d   :  { %v4691_v10 = vmax.f32 %v2210_v4, 0.0  ;;  %v4692_v11 = vmax.f32 %v2280_v6, 0.0  ;;  %8044 = vmatpush3.msra.mxu1 %v4682_v3 }
 0x11e   :  { %8045 = vmatprep.subr.mxu1 %v8336_v0 }
 0x11f   :  { %8051 = vmatpush3.msra.mxu0 %v4692_v11  ;;  %8046 = vmatpush3.msra.mxu1 %v4681_v8 }
 0x120   :  { %v2349_v15 = vpop.f32.mrf.mxu0  ;;  %v2419_v16 = vpop.f32.mrf.mxu1  ;;  %8052 = vmatprep.subr.mxu0 %v8336_v0  ;;  %8048 = vmatmul.mubr.msk.f32.vlgmr.msra.gmra.mxu1 %vm4732_vm2, %v9250_v5 }
 0x121   :  { %v2350_v18 = vadd.f32 %v2349_v15, %v9230_v48  ;;  %v2420_v19 = vadd.f32 %v2419_v16, %v9230_v48  ;;  %8053 = vmatpush3.msra.mxu0 %v4691_v10  ;;  %8061 = vmatprep.subr.mxu1 %v8336_v0 }
 0x122   :  { %v7752_v20 = vpop.f32.mrf.mxu0  ;;  %8054 = vmatprep.subr.mxu0 %v8336_v0  ;;  %8069 = vmatprep.mubr.msk.f32.mxu1 %vm8337_vm1, %v8336_v0  ;;  %v7759_v25 = vpop.f32.mrf.mxu1 }
 0x123   :  { %v4693_v23 = vmax.f32 %v2350_v18, 0.0  ;;  %v4694_v24 = vmax.f32 %v2420_v19, 0.0  ;;  %8055 = vmatpush3.msra.mxu0 %v4684_v17 }
 0x124   :  { %8056 = vmatprep.subr.mxu0 %v8336_v0 }
 0x125   :  { %8062 = vmatpush3.msra.mxu1 %v4694_v24  ;;  %8057 = vmatpush3.msra.mxu0 %v4683_v21 }
 0x126   :  { %v2489_v27 = vpop.f32.mrf.mxu0  ;;  %v2559_v28 = vpop.f32.mrf.mxu1  ;;  %8063 = vmatprep.subr.mxu1 %v8336_v0  ;;  %8059 = vmatmul.mubr.msk.f32.vlgmr.msra.gmra.mxu0 %vm4732_vm2, %v9250_v5 }
 0x127   :  { %8064 = vmatpush3.msra.mxu1 %v4693_v23  ;;  %8072 = vmatprep.subr.mxu0 %v8336_v0  ;;  %v2560_v51 = vadd.f32 %v2559_v28, %v9230_v48  ;;  %v2490_v53 = vadd.f32 %v2489_v27, %v9230_v48 }
 0x128   :  { %v7766_v30 = vpop.f32.mrf.mxu0  ;;  %v7773_v31 = vpop.f32.mrf.mxu1  ;;  %8065 = vmatprep.subr.mxu1 %v8336_v0  ;;  %8080 = vmatprep.mubr.msk.f32.mxu0 %vm8337_vm1, %v8336_v0 }
 0x129   :  { %8066 = vmatpush3.msra.mxu1 %v4686_v29  ;;  %v4696_v57 = vmax.f32 %v2560_v51, 0.0  ;;  %v4695_v62 = vmax.f32 %v2490_v53, 0.0 }
 0x12a   :  { %8067 = vmatprep.subr.mxu1 %v8336_v0 }
 0x12b   :  { %8068 = vmatpush3.msra.mxu1 %v4685_v32 }
 0x12c   :  { %v2629_v33 = vpop.f32.mrf.mxu0  ;;  %8070 = vmatmul.mubr.msk.f32.vlgmr.msra.gmra.mxu1 %vm4732_vm2, %v9250_v5  ;;  %8083 = vmatprep.subr.mxu1 %v8336_v0 }
 0x12d   :  { %v2699_v13 = vpop.f32.mrf.mxu1  ;;  %8091 = vmatprep.mubr.msk.f32.mxu1 %vm8337_vm1, %v8336_v0  ;;  %v2630_v2 = vadd.f32 %v2629_v33, %v9230_v48 }
 0x12e   :  { %v7780_v34 = vpop.f32.mrf.mxu0  ;;  %v2700_v63 = vadd.f32 %v2699_v13, %v9230_v48 }
 0x12f   :  { %v7787_v35 = vpop.f32.mrf.mxu1  ;;  %v4697_v11 = vmax.f32 %v2630_v2, 0.0 }
 0x130   :  { %v4698_v6 = vmax.f32 %v2700_v63, 0.0 }
 0x133   :  { %v2769_v36 = vpop.f32.mrf.mxu0  ;;  %v2839_v37 = vpop.f32.mrf.mxu1 }
 0x134   :  { %v2840_v14 = vadd.f32 %v2839_v37, %v9230_v48  ;;  %v2770_v16 = vadd.f32 %v2769_v36, %v9230_v48 }
 0x135   :  { %v7794_v38 = vpop.f32.mrf.mxu0  ;;  %v7801_v39 = vpop.f32.mrf.mxu1 }
 0x136   :  { %v4700_v20 = vmax.f32 %v2840_v14, 0.0  ;;  %v4699_v25 = vmax.f32 %v2770_v16, 0.0 }
 0x139   :  { %v9351_v40 = vpop.f32.mrf.mxu0  ;;  %v9353_v41 = vpop.f32.mrf.mxu1 }
 0x13a   :  { %v2980_v26 = vadd.f32 %v9353_v41, %v9230_v48  ;;  %v2910_v28 = vadd.f32 %v9351_v40, %v9230_v48 }
 0x13b   :  { %v7808_v42 = vpop.f32.mrf.mxu0  ;;  %v7815_v43 = vpop.f32.mrf.mxu1 }
 0x13c   :  { %v4702_v31 = vmax.f32 %v2980_v26, 0.0  ;;  %v4701_v13 = vmax.f32 %v2910_v28, 0.0 }
 0x13f   :  { %v3049_v44 = vpop.f32.mrf.mxu0  ;;  %v3119_v45 = vpop.f32.mrf.mxu1 }
 0x140   :  { %v3050_v46 = vadd.f32 %v3049_v44, %v9230_v48  ;;  %v3120_v47 = vadd.f32 %v3119_v45, %v9230_v48 }
 0x141   :  { %v7822_v49 = vpop.f32.mrf.mxu0  ;;  %v7829_v50 = vpop.f32.mrf.mxu1 }
 0x142   :  { %v4704_v52 = vmax.f32 %v3120_v47, 0.0  ;;  %v4703_v54 = vmax.f32 %v3050_v46, 0.0 }
 0x144   :  { %8073 = vmatpush3.msra.mxu0 %v4704_v52 }
 0x145   :  { %v3189_v55 = vpop.f32.mrf.mxu0  ;;  %v3259_v56 = vpop.f32.mrf.mxu1  ;;  %8074 = vmatprep.subr.mxu0 %v8336_v0 }
 0x146   :  { %v3190_v58 = vadd.f32 %v3189_v55, %v9230_v48  ;;  %v3260_v59 = vadd.f32 %v3259_v56, %v9230_v48  ;;  %8075 = vmatpush3.msra.mxu0 %v4703_v54 }
 0x147   :  { %v7836_v60 = vpop.f32.mrf.mxu0  ;;  %v7843_v61 = vpop.f32.mrf.mxu1  ;;  %8076 = vmatprep.subr.mxu0 %v8336_v0 }
 0x148   :  { %v4706_v1 = vmax.f32 %v3260_v59, 0.0  ;;  %8077 = vmatpush3.msra.mxu0 %v4696_v57  ;;  %v4705_v3 = vmax.f32 %v3190_v58, 0.0 }
 0x149   :  { %8078 = vmatprep.subr.mxu0 %v8336_v0 }
 0x14a   :  { %8084 = vmatpush3.msra.mxu1 %v4706_v1  ;;  %8079 = vmatpush3.msra.mxu0 %v4695_v62 }
 0x14b   :  { %v3329_v4 = vpop.f32.mrf.mxu0  ;;  %8085 = vmatprep.subr.mxu1 %v8336_v0  ;;  %8081 = vmatmul.mubr.msk.f32.vlgmr.msra.gmra.mxu0 %vm4732_vm2, %v9250_v5 }
 0x14c   :  { %v3399_v7 = vpop.f32.mrf.mxu1  ;;  %8086 = vmatpush3.msra.mxu1 %v4705_v3  ;;  %8094 = vmatprep.subr.mxu0 %v8336_v0  ;;  %v3330_v8 = vadd.f32 %v3329_v4, %v9230_v48 }
 0x14d   :  { %v3400_v9 = vadd.f32 %v3399_v7, %v9230_v48  ;;  %v7850_v10 = vpop.f32.mrf.mxu0  ;;  %8087 = vmatprep.subr.mxu1 %v8336_v0  ;;  %8102 = vmatprep.mubr.msk.f32.mxu0 %vm8337_vm1, %v8336_v0 }
 0x14e   :  { %v7857_v12 = vpop.f32.mrf.mxu1  ;;  %8088 = vmatpush3.msra.mxu1 %v4698_v6  ;;  %v4707_v17 = vmax.f32 %v3330_v8, 0.0 }
 0x14f   :  { %v4708_v15 = vmax.f32 %v3400_v9, 0.0  ;;  %8089 = vmatprep.subr.mxu1 %v8336_v0 }
 0x150   :  { %8090 = vmatpush3.msra.mxu1 %v4697_v11 }
 0x151   :  { %8095 = vmatpush3.msra.mxu0 %v4708_v15  ;;  %8092 = vmatmul.mubr.msk.f32.vlgmr.msra.gmra.mxu1 %vm4732_vm2, %v9250_v5 }
 0x152   :  { %v3469_v18 = vpop.f32.mrf.mxu0  ;;  %v3539_v19 = vpop.f32.mrf.mxu1  ;;  %8096 = vmatprep.subr.mxu0 %v8336_v0  ;;  %8105 = vmatprep.subr.mxu1 %v8336_v0 }
 0x153   :  { %v3470_v21 = vadd.f32 %v3469_v18, %v9230_v48  ;;  %v3540_v22 = vadd.f32 %v3539_v19, %v9230_v48  ;;  %8097 = vmatpush3.msra.mxu0 %v4707_v17  ;;  %8113 = vmatprep.mubr.msk.f32.mxu1 %vm8337_vm1, %v8336_v0 }
 0x154   :  { %v7864_v23 = vpop.f32.mrf.mxu0  ;;  %v7871_v24 = vpop.f32.mrf.mxu1  ;;  %8098 = vmatprep.subr.mxu0 %v8336_v0 }
 0x155   :  { %v4710_v27 = vmax.f32 %v3540_v22, 0.0  ;;  %8099 = vmatpush3.msra.mxu0 %v4700_v20  ;;  %v4709_v29 = vmax.f32 %v3470_v21, 0.0 }
 0x156   :  { %8100 = vmatprep.subr.mxu0 %v8336_v0 }
 0x157   :  { %8106 = vmatpush3.msra.mxu1 %v4710_v27  ;;  %8101 = vmatpush3.msra.mxu0 %v4699_v25 }
 0x158   :  { %v3609_v30 = vpop.f32.mrf.mxu0  ;;  %8107 = vmatprep.subr.mxu1 %v8336_v0  ;;  %8103 = vmatmul.mubr.msk.f32.vlgmr.msra.gmra.mxu0 %vm4732_vm2, %v9250_v5 }
 0x159   :  { %v3679_v32 = vpop.f32.mrf.mxu1  ;;  %8108 = vmatpush3.msra.mxu1 %v4709_v29  ;;  %8116 = vmatprep.subr.mxu0 %v8336_v0  ;;  %v3610_v56 = vadd.f32 %v3609_v30, %v9230_v48 }
 0x15a   :  { %v7878_v33 = vpop.f32.mrf.mxu0  ;;  %8109 = vmatprep.subr.mxu1 %v8336_v0  ;;  %8124 = vmatprep.mubr.msk.f32.mxu0 %vm8337_vm1, %v8336_v0  ;;  %v3680_v54 = vadd.f32 %v3679_v32, %v9230_v48 }
 0x15b   :  { %v7885_v34 = vpop.f32.mrf.mxu1  ;;  %8110 = vmatpush3.msra.mxu1 %v4702_v31  ;;  %v4711_v2 = vmax.f32 %v3610_v56, 0.0 }
 0x15c   :  { %8111 = vmatprep.subr.mxu1 %v8336_v0  ;;  %v4712_v60 = vmax.f32 %v3680_v54, 0.0 }
 0x15d   :  { %8112 = vmatpush3.msra.mxu1 %v4701_v13 }
 0x15e   :  { %8114 = vmatmul.mubr.msk.f32.vlgmr.msra.gmra.mxu1 %vm4732_vm2, %v9250_v5  ;;  %8127 = vmatprep.subr.mxu1 %v8336_v0 }
 0x15f   :  { %v3749_v35 = vpop.f32.mrf.mxu0  ;;  %v3819_v36 = vpop.f32.mrf.mxu1  ;;  %8135 = vmatprep.mubr.msk.f32.mxu1 %vm8337_vm1, %v8336_v0 }
 0x160   :  { %v3820_v3 = vadd.f32 %v3819_v36, %v9230_v48  ;;  %v3750_v6 = vadd.f32 %v3749_v35, %v9230_v48 }
 0x161   :  { %v7892_v37 = vpop.f32.mrf.mxu0  ;;  %v7899_v38 = vpop.f32.mrf.mxu1 }
 0x162   :  { %v4714_v9 = vmax.f32 %v3820_v3, 0.0  ;;  %v4713_v15 = vmax.f32 %v3750_v6, 0.0  ;;  %v6677_v6 = vld [vmem:[%s9773_s6 + $0x40] sm:$0xff] }
 0x165   :  { %v3889_v39 = vpop.f32.mrf.mxu0 }
 0x166   :  { %v3959_v40 = vpop.f32.mrf.mxu1  ;;  %v3890_v19 = vadd.f32 %v3889_v39, %v9230_v48 }
 0x167   :  { %v7906_v41 = vpop.f32.mrf.mxu0  ;;  %v3960_v17 = vadd.f32 %v3959_v40, %v9230_v48 }
 0x168   :  { %v7913_v42 = vpop.f32.mrf.mxu1  ;;  %v4715_v28 = vmax.f32 %v3890_v19, 0.0  ;;  %v6807_v19 = vld [vmem:[%s9774_s8 + $0x10] sm:$0xff] }
 0x169   :  { %v4716_v23 = vmax.f32 %v3960_v17, 0.0  ;;  %v6809_v17 = vld [vmem:[%s9774_s8 + $0x20] sm:$0xff] }
 0x16c   :  { %v9405_v43 = vpop.f32.mrf.mxu0  ;;  %v9407_v44 = vpop.f32.mrf.mxu1 }
 0x16d   :  { %v4100_v29 = vadd.f32 %v9407_v44, %v9230_v48  ;;  %v4030_v31 = vadd.f32 %v9405_v43, %v9230_v48  ;;  %v44_v43 = vld [vmem:[%s9772_s3 + $0x10] sm:$0xff] }
 0x16e   :  { %v7920_v45 = vpop.f32.mrf.mxu0  ;;  %v7927_v46 = vpop.f32.mrf.mxu1  ;;  %5874 = vperm.xlu1 %8334, %v44_v43  }
 0x16f   :  { %v4718_v33 = vmax.f32 %v4100_v29, 0.0  ;;  %v4717_v13 = vmax.f32 %v4030_v31, 0.0  ;;  %v45_v45 = vld [vmem:[%s9772_s3 + $0x18] sm:$0xff] }
 0x172   :  { %v4169_v47 = vpop.f32.mrf.mxu0  ;;  %6166 = vperm.xlu1 %8334, %v45_v45  }
 0x173   :  { %v4239_v49 = vpop.f32.mrf.mxu1  ;;  %v4170_v50 = vadd.f32 %v4169_v47, %v9230_v48 }
 0x174   :  { %v4240_v51 = vadd.f32 %v4239_v49, %v9230_v48  ;;  %v7934_v52 = vpop.f32.mrf.mxu0 }
 0x175   :  { %v7941_v53 = vpop.f32.mrf.mxu1  ;;  %v4719_v57 = vmax.f32 %v4170_v50, 0.0  ;;  %v6683_v52 = vld [vmem:[%s9773_s6 + $0x70] sm:$0xff] }
 0x176   :  { %v4720_v55 = vmax.f32 %v4240_v51, 0.0  ;;  %6757 = vperm.xlu1 %8334, %v6683_v52  }
 0x178   :  { %8117 = vmatpush3.msra.mxu0 %v4720_v55 }
 0x179   :  { %v4309_v58 = vpop.f32.mrf.mxu0  ;;  %v4379_v59 = vpop.f32.mrf.mxu1  ;;  %8118 = vmatprep.subr.mxu0 %v8336_v0 }
 0x17a   :  { %v4310_v61 = vadd.f32 %v4309_v58, %v9230_v48  ;;  %v4380_v62 = vadd.f32 %v4379_v59, %v9230_v48  ;;  %8119 = vmatpush3.msra.mxu0 %v4719_v57  ;;  %v6681_v58 = vld [vmem:[%s9773_s6 + $0x60] sm:$0xff] }
 0x17b   :  { %v7948_v63 = vpop.f32.mrf.mxu0  ;;  %v7955_v1 = vpop.f32.mrf.mxu1  ;;  %8120 = vmatprep.subr.mxu0 %v8336_v0  ;;  %6747 = vperm.xlu1 %8334, %v6681_v58  }
 0x17c   :  { %v4722_v4 = vmax.f32 %v4380_v62, 0.0  ;;  %8121 = vmatpush3.msra.mxu0 %v4712_v60  ;;  %v4721_v7 = vmax.f32 %v4310_v61, 0.0  ;;  %v9482_v60 = vld [vmem:[%s9771_s2 + $0x10] sm:$0xff] }
 0x17d   :  { %8122 = vmatprep.subr.mxu0 %v8336_v0  ;;  %v6679_v62 = vld [vmem:[%s9773_s6 + $0x50] sm:$0xff] }
 0x17e   :  { %8128 = vmatpush3.msra.mxu1 %v4722_v4  ;;  %8123 = vmatpush3.msra.mxu0 %v4711_v2 }
 0x17f   :  { %v4449_v8 = vpop.f32.mrf.mxu0  ;;  %8129 = vmatprep.subr.mxu1 %v8336_v0  ;;  %8125 = vmatmul.mubr.msk.f32.vlgmr.msra.gmra.mxu0 %vm4732_vm2, %v9250_v5 }
 0x180   :  { %v4519_v10 = vpop.f32.mrf.mxu1  ;;  %8130 = vmatpush3.msra.mxu1 %v4721_v7  ;;  %8138 = vmatprep.subr.mxu0 %v8336_v0  ;;  %v4450_v11 = vadd.f32 %v4449_v8, %v9230_v48 }
 0x181   :  { %v4520_v12 = vadd.f32 %v4519_v10, %v9230_v48  ;;  %v7962_v14 = vpop.f32.mrf.mxu0  ;;  %8131 = vmatprep.subr.mxu1 %v8336_v0  ;;  %8146 = vmatprep.mubr.msk.f32.mxu0 %vm8337_vm1, %v8336_v0  ;;  %v6675_v10 = vld [vmem:[%s9773_s6 + $0x30] sm:$0xff] }
 0x182   :  { %v7969_v16 = vpop.f32.mrf.mxu1  ;;  %8132 = vmatpush3.msra.mxu1 %v4714_v9  ;;  %v4723_v20 = vmax.f32 %v4450_v11, 0.0  ;;  %6737 = vperm.xlu1 %8334, %v6679_v62   ;;  %v6671_v14 = vld [vmem:[%s9773_s6 + $0x10] sm:$0xff] }
 0x183   :  { %v4724_v18 = vmax.f32 %v4520_v12, 0.0  ;;  %8133 = vmatprep.subr.mxu1 %v8336_v0  ;;  %v6673_v12 = vld [vmem:[%s9773_s6 + $0x20] sm:$0xff]  ;;  %v6811_v16 = vld [vmem:[%s9774_s8 + $0x30] sm:$0xff] }
 0x184   :  { %8134 = vmatpush3.msra.mxu1 %v4713_v15  ;;  %v6669_v15 = vld [vmem:[%s9773_s6] sm:$0xff] }
 0x185   :  { %8139 = vmatpush3.msra.mxu0 %v4724_v18  ;;  %8136 = vmatmul.mubr.msk.f32.vlgmr.msra.gmra.mxu1 %vm4732_vm2, %v9250_v5 }
 0x186   :  { %v4589_v21 = vpop.f32.mrf.mxu0  ;;  %v4659_v22 = vpop.f32.mrf.mxu1  ;;  %8140 = vmatprep.subr.mxu0 %v8336_v0  ;;  %8149 = vmatprep.subr.mxu1 %v8336_v0 }
 0x187   :  { %v4590_v24 = vadd.f32 %v4589_v21, %v9230_v48  ;;  %v4660_v25 = vadd.f32 %v4659_v22, %v9230_v48  ;;  %8141 = vmatpush3.msra.mxu0 %v4723_v20  ;;  %8157 = vmatprep.mubr.msk.f32.mxu1 %vm8337_vm1, %v8336_v0  ;;  %v6805_v21 = vld [vmem:[%s9774_s8] sm:$0xff] }
 0x188   :  { %v7976_v26 = vpop.f32.mrf.mxu0  ;;  %v7983_v27 = vpop.f32.mrf.mxu1  ;;  %8142 = vmatprep.subr.mxu0 %v8336_v0  ;;  %6727 = vperm.xlu1 %8334, %v6677_v6   ;;  %v6244_v6 = vld [vmem:[%s9776_s1] sm:$0x1f] }
 0x189   :  { %v4726_v30 = vmax.f32 %v4660_v25, 0.0  ;;  %8143 = vmatpush3.msra.mxu0 %v4716_v23  ;;  %v4725_v32 = vmax.f32 %v4590_v24, 0.0 }
 0x18a   :  { %8144 = vmatprep.subr.mxu0 %v8336_v0 }
 0x18b   :  { %8150 = vmatpush3.msra.mxu1 %v4726_v30  ;;  %8145 = vmatpush3.msra.mxu0 %v4715_v28 }
 0x18c   :  { %8151 = vmatprep.subr.mxu1 %v8336_v0  ;;  %8147 = vmatmul.mubr.msk.f32.vlgmr.msra.gmra.mxu0 %vm4732_vm2, %v9250_v5 }
 0x18d   :  { %8152 = vmatpush3.msra.mxu1 %v4725_v32  ;;  %8160 = vmatprep.subr.mxu0 %v8336_v0 }
 0x18e   :  { %8153 = vmatprep.subr.mxu1 %v8336_v0  ;;  %8168 = vmatprep.mubr.msk.f32.mxu0 %vm8337_vm1, %v8336_v0 }
 0x18f   :  { %8154 = vmatpush3.msra.mxu1 %v4718_v33  ;;  %6717 = vperm.xlu1 %8334, %v6675_v10   ;;  %v6263_v10 = vld [vmem:[%s9777_s5 + $0x10] sm:$0xff] }
 0x190   :  { %8155 = vmatprep.subr.mxu1 %v8336_v0 }
 0x191   :  { %8156 = vmatpush3.msra.mxu1 %v4717_v13 }
 0x192   :  { %8158 = vmatmul.mubr.msk.f32.vlgmr.msra.gmra.mxu1 %vm4732_vm2, %v9250_v5  ;;  %8171 = vmatprep.subr.mxu1 %v8336_v0  ;;  %v9462_v5 = vpop.permute.xlu0 %4729 }
 0x193   :  { %8179 = vmatprep.mubr.msk.f32.mxu1 %vm8337_vm1, %v8336_v0  ;;  %6707 = vperm.xlu1 %8334, %v6673_v12   ;;  %v6265_v12 = vld [vmem:[%s9777_s5 + $0x20] sm:$0xff] }
 0x197   :  { %6697 = vperm.xlu1 %8334, %v6671_v14   ;;  %v6266_v14 = vld [vmem:[%s9777_s5 + $0x28] sm:$0xff] }
 0x19b   :  { %6687 = vperm.xlu1 %8334, %v6669_v15   ;;  %v6267_v15 = vld [vmem:[%s9777_s5 + $0x30] sm:$0xff] }
 0x19f   :  { %6845 = vperm.xlu1 %8334, %v6811_v16   ;;  %v6268_v16 = vld [vmem:[%s9777_s5 + $0x38] sm:$0xff] }
 0x1a3   :  { %6835 = vperm.xlu1 %8334, %v6809_v17   ;;  %v6269_v17 = vld [vmem:[%s9777_s5 + $0x40] sm:$0xff] }
 0x1a7   :  { %6825 = vperm.xlu1 %8334, %v6807_v19   ;;  %v6271_v19 = vld [vmem:[%s9777_s5 + $0x50] sm:$0xff] }
 0x1ab   :  { %6815 = vperm.xlu1 %8334, %v6805_v21   ;;  %v6273_v21 = vld [vmem:[%s9777_s5 + $0x60] sm:$0xff] }
 0x1b5   :  { %v4802_v48 = vpop.f32.mrf.mxu0 }
 0x1b6   :  { %v4872_v34 = vpop.f32.mrf.mxu1  ;;  %v4803_v53 = vadd.f32 %v4802_v48, %v9462_v5 }
 0x1b7   :  { %v7994_v35 = vpop.f32.mrf.mxu0  ;;  %v4873_v50 = vadd.f32 %v4872_v34, %v9462_v5 }
 0x1b8   :  { %v8005_v36 = vpop.f32.mrf.mxu1  ;;  %v5856_v59 = vmax.f32 %v4803_v53, 0.0 }
 0x1b9   :  { %v5857_v56 = vmax.f32 %v4873_v50, 0.0 }
 0x1bd   :  { %v4942_v37 = vpop.f32.mrf.mxu0 }
 0x1be   :  { %v4943_v7 = vadd.f32 %v4942_v37, %v9462_v5 }
 0x1bf   :  { %v8016_v38 = vpop.f32.mrf.mxu0 }
 0x1c0   :  { %v5012_v39 = vpop.f32.mrf.mxu1  ;;  %v5858_v11 = vmax.f32 %v4943_v7, 0.0  ;;  %v6261_v7 = vld [vmem:[%s9777_s5] sm:$0xff] }
 0x1c1   :  { %v5013_v3 = vadd.f32 %v5012_v39, %v9462_v5 }
 0x1c2   :  { %v8027_v40 = vpop.f32.mrf.mxu1 }
 0x1c3   :  { %v5859_v9 = vmax.f32 %v5013_v3, 0.0 }
 0x1da   :  { %v5082_v41 = vpop.f32.mrf.mxu0 }
 0x1db   :  { %v5083_v46 = vadd.f32 %v5082_v41, %v9462_v5 }
 0x1dc   :  { %v8038_v42 = vpop.f32.mrf.mxu0 }
 0x1dd   :  { %v5860_v54 = vmax.f32 %v5083_v46, 0.0 }
 0x1e0   :  { %v5152_v44 = vpop.f32.mrf.mxu1 }
 0x1e1   :  { %v5153_v47 = vadd.f32 %v5152_v44, %v9462_v5 }
 0x1e2   :  { %v8049_v49 = vpop.f32.mrf.mxu1 }
 0x1e3   :  { %v5861_v51 = vmax.f32 %v5153_v47, 0.0 }
 0x1e5   :  { %8161 = vmatpush3.msra.mxu0 %v5861_v51 }
 0x1e6   :  { %v5222_v55 = vpop.f32.mrf.mxu0  ;;  %8162 = vmatprep.subr.mxu0 %v8336_v0 }
 0x1e7   :  { %8163 = vmatpush3.msra.mxu0 %v5860_v54  ;;  %v5223_v63 = vadd.f32 %v5222_v55, %v9462_v5 }
 0x1e8   :  { %8164 = vmatprep.subr.mxu0 %v8336_v0  ;;  %v8060_v57 = vpop.f32.mrf.mxu0 }
 0x1e9   :  { %8165 = vmatpush3.msra.mxu0 %v5857_v56  ;;  %v5862_v8 = vmax.f32 %v5223_v63, 0.0  ;;  %v5875_v56 = vpop.permute.xlu1 %5874 }
 0x1ea   :  { %8166 = vmatprep.subr.mxu0 %v8336_v0 }
 0x1eb   :  { %8167 = vmatpush3.msra.mxu0 %v5856_v59 }
 0x1ec   :  { %v5292_v61 = vpop.f32.mrf.mxu1  ;;  %8182 = vmatprep.subr.mxu0 %v8336_v0  ;;  %8169 = vmatmul.mubr.msk.f32.vlgmr.msra.gmra.mxu0 %vm4732_vm2, %v9482_v60 }
 0x1ed   :  { %v5293_v1 = vadd.f32 %v5292_v61, %v9462_v5  ;;  %8190 = vmatprep.mubr.msk.f32.mxu0 %vm8337_vm1, %v8336_v0 }
 0x1ee   :  { %v8071_v2 = vpop.f32.mrf.mxu1 }
 0x1ef   :  { %v5863_v4 = vmax.f32 %v5293_v1, 0.0 }
 0x1f1   :  { %8172 = vmatpush3.msra.mxu1 %v5863_v4  ;;  %v41_v4 = vld [vmem:[%s9771_s2 + $0x18] sm:$0xff] }
 0x1f2   :  { %8173 = vmatprep.subr.mxu1 %v8336_v0 }
 0x1f3   :  { %8174 = vmatpush3.msra.mxu1 %v5862_v8  ;;  %v6262_v8 = vld [vmem:[%s9777_s5 + $0x8] sm:$0xff] }
 0x1f4   :  { %8175 = vmatprep.subr.mxu1 %v8336_v0 }
 0x1f5   :  { %8176 = vmatpush3.msra.mxu1 %v5859_v9  ;;  %v6245_v9 = vld [vmem:[%s9778_s4] sm:$0xff] }
 0x1f6   :  { %8177 = vmatprep.subr.mxu1 %v8336_v0 }
 0x1f7   :  { %8178 = vmatpush3.msra.mxu1 %v5858_v11  ;;  %v6264_v11 = vld [vmem:[%s9777_s5 + $0x18] sm:$0xff] }
 0x1f8   :  { %8180 = vmatmul.mubr.msk.f32.vlgmr.msra.gmra.mxu1 %vm4732_vm2, %v9482_v60  ;;  %8193 = vmatprep.subr.mxu1 %v8336_v0 }
 0x1f9   :  { %8201 = vmatprep.mubr.msk.f32.mxu1 %vm8337_vm1, %v8336_v0 }
 0x20b   :  { %v5362_v18 = vpop.f32.mrf.mxu0 }
 0x20c   :  { %v5363_v34 = vadd.f32 %v5362_v18, %v9462_v5  ;;  %v6270_v18 = vld [vmem:[%s9777_s5 + $0x48] sm:$0xff] }
 0x20d   :  { %v8082_v20 = vpop.f32.mrf.mxu0 }
 0x20e   :  { %v5864_v38 = vmax.f32 %v5363_v34, 0.0  ;;  %v6272_v20 = vld [vmem:[%s9777_s5 + $0x58] sm:$0xff] }
 0x20f   :  { %v6252_v34 = vld [vmem:[%s9778_s4 + $0x38] sm:$0xff] }
 0x211   :  { %v5432_v22 = vpop.f32.mrf.mxu1 }
 0x212   :  { %v5433_v13 = vadd.f32 %v5432_v22, %v9462_v5  ;;  %v6274_v22 = vld [vmem:[%s9777_s5 + $0x68] sm:$0xff] }
 0x213   :  { %v8093_v23 = vpop.f32.mrf.mxu1 }
 0x214   :  { %v5865_v36 = vmax.f32 %v5433_v13, 0.0  ;;  %v6275_v23 = vld [vmem:[%s9777_s5 + $0x70] sm:$0xff]  ;;  %v6250_v13 = vld [vmem:[%s9778_s4 + $0x28] sm:$0xff] }
 0x218   :  { %v5502_v24 = vpop.f32.mrf.mxu0 }
 0x219   :  { %v5503_v46 = vadd.f32 %v5502_v24, %v9462_v5  ;;  %v6276_v24 = vld [vmem:[%s9777_s5 + $0x78] sm:$0xff] }
 0x21a   :  { %v8104_v25 = vpop.f32.mrf.mxu0 }
 0x21b   :  { %v5866_v50 = vmax.f32 %v5503_v46, 0.0  ;;  %v6167_v25 = vpop.permute.xlu1 %6166 }
 0x21e   :  { %v5572_v26 = vpop.f32.mrf.mxu1 }
 0x21f   :  { %v5573_v44 = vadd.f32 %v5572_v26, %v9462_v5 }
 0x220   :  { %v8115_v27 = vpop.f32.mrf.mxu1 }
 0x221   :  { %v5867_v49 = vmax.f32 %v5573_v44, 0.0 }
 0x23f   :  { %v5642_v28 = vpop.f32.mrf.mxu0 }
 0x240   :  { %v5643_v31 = vadd.f32 %v5642_v28, %v9462_v5 }
 0x241   :  { %v8126_v29 = vpop.f32.mrf.mxu0 }
 0x242   :  { %v5868_v35 = vmax.f32 %v5643_v31, 0.0  ;;  %v6247_v31 = vld [vmem:[%s9778_s4 + $0x10] sm:$0xff] }
 0x245   :  { %v5712_v30 = vpop.f32.mrf.mxu1 }
 0x246   :  { %v5713_v32 = vadd.f32 %v5712_v30, %v9462_v5  ;;  %v6246_v30 = vld [vmem:[%s9778_s4 + $0x8] sm:$0xff] }
 0x247   :  { %v8137_v33 = vpop.f32.mrf.mxu1 }
 0x248   :  { %v5869_v48 = vmax.f32 %v5713_v32, 0.0  ;;  %v6248_v32 = vld [vmem:[%s9778_s4 + $0x18] sm:$0xff]  ;;  %v6249_v33 = vld [vmem:[%s9778_s4 + $0x20] sm:$0xff] }
 0x24a   :  { %8183 = vmatpush3.msra.mxu0 %v5869_v48  ;;  %v6251_v48 = vld [vmem:[%s9778_s4 + $0x30] sm:$0xff] }
 0x24b   :  { %8184 = vmatprep.subr.mxu0 %v8336_v0 }
 0x24c   :  { %v5782_v37 = vpop.f32.mrf.mxu0  ;;  %8185 = vmatpush3.msra.mxu0 %v5868_v35  ;;  %v6253_v35 = vld [vmem:[%s9778_s4 + $0x40] sm:$0xff] }
 0x24d   :  { %8186 = vmatprep.subr.mxu0 %v8336_v0  ;;  %v5783_v41 = vadd.f32 %v5782_v37, %v9462_v5  ;;  %v6255_v37 = vld [vmem:[%s9778_s4 + $0x50] sm:$0xff] }
 0x24e   :  { %8187 = vmatpush3.msra.mxu0 %v5865_v36  ;;  %v8148_v39 = vpop.f32.mrf.mxu0  ;;  %v6254_v36 = vld [vmem:[%s9778_s4 + $0x48] sm:$0xff] }
 0x24f   :  { %8188 = vmatprep.subr.mxu0 %v8336_v0  ;;  %v5870_v47 = vmax.f32 %v5783_v41, 0.0  ;;  %v6257_v39 = vld [vmem:[%s9778_s4 + $0x60] sm:$0xff]  ;;  %v6259_v41 = vld [vmem:[%s9778_s4 + $0x70] sm:$0xff] }
 0x250   :  { %8189 = vmatpush3.msra.mxu0 %v5864_v38  ;;  %v6256_v38 = vld [vmem:[%s9778_s4 + $0x58] sm:$0xff] }
 0x251   :  { %8191 = vmatmul.mubr.msk.f32.vlgmr.msra.gmra.mxu0 %vm4732_vm2, %v9482_v60  ;;  %8204 = vmatprep.subr.mxu0 %v8336_v0 }
 0x252   :  { %v5852_v40 = vpop.f32.mrf.mxu1  ;;  %8212 = vmatprep.mubr.msk.f32.mxu0 %vm8337_vm1, %v8336_v0 }
 0x253   :  { %v5853_v42 = vadd.f32 %v5852_v40, %v9462_v5  ;;  %v6258_v40 = vld [vmem:[%s9778_s4 + $0x68] sm:$0xff] }
 0x254   :  { %v8159_v43 = vpop.f32.mrf.mxu1 }
 0x255   :  { %v5871_v45 = vmax.f32 %v5853_v42, 0.0  ;;  %v6260_v42 = vld [vmem:[%s9778_s4 + $0x78] sm:$0xff]  ;;  %v6797_v43 = vld [vmem:[%s9779_s7] sm:$0xff] }
 0x257   :  { %8194 = vmatpush3.msra.mxu1 %v5871_v45 }
 0x258   :  { %8195 = vmatprep.subr.mxu1 %v8336_v0 }
 0x259   :  { %8196 = vmatpush3.msra.mxu1 %v5870_v47 }
 0x25a   :  { %8197 = vmatprep.subr.mxu1 %v8336_v0 }
 0x25b   :  { %8198 = vmatpush3.msra.mxu1 %v5867_v49 }
 0x25c   :  { %8199 = vmatprep.subr.mxu1 %v8336_v0 }
 0x25d   :  { %8200 = vmatpush3.msra.mxu1 %v5866_v50 }
 0x25e   :  { %8202 = vmatmul.mubr.msk.f32.vlgmr.msra.gmra.mxu1 %vm4732_vm2, %v9482_v60  ;;  %8215 = vmatprep.subr.msk.mxu1 %vm6326_vm3, %v6244_v6 }
 0x25f   :  { %8216 = vmatpush3.msk.msra.mxu1 %vm6326_vm3, %v6244_v6  ;;  %8217 = vmatprep.mubr.msk.f32.mxu1 %vm6277_vm4, %v6261_v7 }
 0x262   :  { %8218 = vmatmul.mubr.msk.f32.vlgmr.msra.gmra.mxu1 %vm6277_vm4, %v6262_v8 }
 0x263   :  { %8220 = vmatprep.mubr.msk.f32.mxu1 %vm6277_vm4, %v6263_v10 }
 0x266   :  { %8221 = vmatmul.mubr.msk.f32.gmra.mxu1 %vm6277_vm4, %v6264_v11 }
 0x267   :  { %8223 = vmatprep.mubr.msk.f32.mxu1 %vm6277_vm4, %v6265_v12 }
 0x26a   :  { %8224 = vmatmul.mubr.msk.f32.gmra.mxu1 %vm6277_vm4, %v6266_v14 }
 0x26b   :  { %8226 = vmatprep.mubr.msk.f32.mxu1 %vm6277_vm4, %v6267_v15 }
 0x26e   :  { %8227 = vmatmul.mubr.msk.f32.gmra.mxu1 %vm6277_vm4, %v6268_v16 }
 0x26f   :  { %8229 = vmatprep.mubr.msk.f32.mxu1 %vm6277_vm4, %v6269_v17 }
 0x272   :  { %8230 = vmatmul.mubr.msk.f32.gmra.mxu1 %vm6277_vm4, %v6270_v18 }
 0x273   :  { %8232 = vmatprep.mubr.msk.f32.mxu1 %vm6277_vm4, %v6271_v19 }
 0x276   :  { %8233 = vmatmul.mubr.msk.f32.gmra.mxu1 %vm6277_vm4, %v6272_v20 }
 0x277   :  { %8235 = vmatprep.mubr.msk.f32.mxu1 %vm6277_vm4, %v6273_v21 }
 0x27a   :  { %8236 = vmatmul.mubr.msk.f32.gmra.mxu1 %vm6277_vm4, %v6274_v22 }
 0x27b   :  { %8238 = vmatprep.mubr.msk.f32.mxu1 %vm6277_vm4, %v6275_v23 }
 0x27e   :  { %8239 = vmatmul.mubr.msk.f32.gmra.mxu1 %vm6277_vm4, %v6276_v24 }
 0x27f   :  { %8299 = vmatprep.mubr.f32.mxu1 %v6797_v43 }
 0x2ac   :  { %v5946_v51 = vpop.f32.mrf.mxu0 }
 0x2ad   :  { %v5947_v1 = vadd.f32 %v5946_v51, %v5875_v56 }
 0x2ae   :  { %v8170_v52 = vpop.f32.mrf.mxu0 }
 0x2af   :  { %v6160_v60 = vmax.f32 %v5947_v1, 0.0 }
 0x2b8   :  { %v6016_v53 = vpop.f32.mrf.mxu1 }
 0x2b9   :  { %v6017_v62 = vadd.f32 %v6016_v53, %v5875_v56 }
 0x2ba   :  { %v8181_v5 = vpop.f32.mrf.mxu1 }
 0x2bb   :  { %v6161_v3 = vmax.f32 %v6017_v62, 0.0 }
 0x311   :  { %v6086_v54 = vpop.f32.mrf.mxu0 }
 0x312   :  { %v6087_v58 = vadd.f32 %v6086_v54, %v5875_v56 }
 0x313   :  { %v8192_v55 = vpop.f32.mrf.mxu0 }
 0x314   :  { %v6162_v2 = vmax.f32 %v6087_v58, 0.0 }
 0x31e   :  { %v6156_v57 = vpop.f32.mrf.mxu1 }
 0x31f   :  { %v6157_v59 = vadd.f32 %v6156_v57, %v5875_v56 }
 0x320   :  { %v8203_v61 = vpop.f32.mrf.mxu1 }
 0x321   :  { %v6163_v63 = vmax.f32 %v6157_v59, 0.0 }
 0x322   :  { %v9697_v44 = vpop.f32.mrf.mxu1 }
 0x323   :  { %8205 = vmatpush3.msra.mxu0 %v6163_v63  ;;  %v6763_v63 = vpop.permute.xlu0 %6762 }
 0x324   :  { %8206 = vmatprep.subr.mxu0 %v8336_v0  ;;  %v9699_v45 = vpop.f32.mrf.mxu1 }
 0x325   :  { %8207 = vmatpush3.msra.mxu0 %v6162_v2 }
 0x326   :  { %8208 = vmatprep.subr.mxu0 %v8336_v0  ;;  %v9701_v46 = vpop.f32.mrf.mxu1 }
 0x327   :  { %8209 = vmatpush3.msra.mxu0 %v6161_v3  ;;  %v6758_v3 = vpop.permute.xlu1 %6757  ;;  %v6753_v7 = vpop.permute.xlu0 %6752 }
 0x328   :  { %8210 = vmatprep.subr.mxu0 %v8336_v0  ;;  %v9703_v47 = vpop.f32.mrf.mxu1 }
 0x329   :  { %8211 = vmatpush3.msra.mxu0 %v6160_v60 }
 0x32a   :  { %8213 = vmatmul.mubr.msk.f32.vlgmr.msra.gmra.mxu0 %vm4732_vm2, %v41_v4  ;;  %v9705_v49 = vpop.f32.mrf.mxu1 }
 0x32b   :  { %8243 = vmatprep.mubr.msk.f32.mxu0 %vm6475_vm5, %v6245_v9  ;;  %v6748_v9 = vpop.permute.xlu1 %6747  ;;  %v6743_v14 = vpop.permute.xlu0 %6742 }
 0x32c   :  { %v9707_v50 = vpop.f32.mrf.mxu1 }
 0x32e   :  { %v8228_v51 = vpop.f32.mrf.mxu1 }
 0x32f   :  { %v6738_v17 = vpop.permute.xlu1 %6737 }
 0x330   :  { %v9709_v52 = vpop.f32.mrf.mxu1 }
 0x332   :  { %v8231_v54 = vpop.f32.mrf.mxu1 }
 0x334   :  { %v6436_v57 = vpop.f32.mrf.mxu1 }
 0x336   :  { %v8234_v61 = vpop.f32.mrf.mxu1 }
 0x338   :  { %v6446_v2 = vpop.f32.mrf.mxu1 }
 0x33a   :  { %v8237_v6 = vpop.f32.mrf.mxu1 }
 0x33c   :  { %v6456_v11 = vpop.f32.mrf.mxu1 }
 0x33e   :  { %v8240_v15 = vpop.f32.mrf.mxu1 }
 0x340   :  { %v6466_v21 = vpop.f32.mrf.mxu1 }
 0x3ea   :  { %v6238_v26 = vpop.f32.mrf.mxu0 }
 0x3eb   :  { %v6239_v27 = vadd.f32 %v6238_v26, %v6167_v25  ;;  %v6733_v26 = vpop.permute.xlu0 %6732 }
 0x3ec   :  { %v8214_v28 = vpop.f32.mrf.mxu0 }
 0x3ed   :  { %v6242_v29 = vmax.f32 %v6239_v27, 0.0 }
 0x3ef   :  { %8241 = vmatprep.subr.mxu0 %v6242_v29 }
 0x3f0   :  { %8242 = vmatpush3.msra.mxu0 %v6242_v29 }
 0x3f1   :  { %8244 = vmatmul.mubr.msk.f32.vlgmr.msra.gmra.mxu0 %vm6475_vm5, %v6246_v30  ;;  %8311 = vmatprep.subr.mxu0 %v8336_v0 }
 0x3f2   :  { %8246 = vmatprep.mubr.msk.f32.mxu0 %vm6475_vm5, %v6247_v31  ;;  %v6728_v31 = vpop.permute.xlu1 %6727 }
 0x3f5   :  { %8247 = vmatmul.mubr.msk.f32.gmra.mxu0 %vm6475_vm5, %v6248_v32 }
 0x3f6   :  { %8249 = vmatprep.mubr.msk.f32.mxu0 %vm6475_vm5, %v6249_v33 }
 0x3f9   :  { %8250 = vmatmul.mubr.msk.f32.gmra.mxu0 %vm6475_vm5, %v6250_v13 }
 0x3fa   :  { %8252 = vmatprep.mubr.msk.f32.mxu0 %vm6475_vm5, %v6251_v48 }
 0x3fd   :  { %8253 = vmatmul.mubr.msk.f32.gmra.mxu0 %vm6475_vm5, %v6252_v34 }
 0x3fe   :  { %8255 = vmatprep.mubr.msk.f32.mxu0 %vm6475_vm5, %v6253_v35 }
 0x401   :  { %8256 = vmatmul.mubr.msk.f32.gmra.mxu0 %vm6475_vm5, %v6254_v36  ;;  %v6723_v36 = vpop.permute.xlu0 %6722 }
 0x402   :  { %8258 = vmatprep.mubr.msk.f32.mxu0 %vm6475_vm5, %v6255_v37 }
 0x405   :  { %8259 = vmatmul.mubr.msk.f32.gmra.mxu0 %vm6475_vm5, %v6256_v38 }
 0x406   :  { %8261 = vmatprep.mubr.msk.f32.mxu0 %vm6475_vm5, %v6257_v39 }
 0x409   :  { %8262 = vmatmul.mubr.msk.f32.gmra.mxu0 %vm6475_vm5, %v6258_v40  ;;  %v6718_v40 = vpop.permute.xlu1 %6717 }
 0x40a   :  { %8264 = vmatprep.mubr.msk.f32.mxu0 %vm6475_vm5, %v6259_v41 }
 0x40d   :  { %8265 = vmatmul.mubr.msk.f32.gmra.mxu0 %vm6475_vm5, %v6260_v42 }
 0x40e   :  { %8327 = vmatprep.mubr.msk.f32.mxu0 %vm8337_vm1, %v8336_v0 }
 0x4b1   :  { %v9711_v53 = vpop.f32.mrf.mxu0 }
 0x4b3   :  { %v9713_v5 = vpop.f32.mrf.mxu0 }
 0x4b5   :  { %v9715_v55 = vpop.f32.mrf.mxu0 }
 0x4b7   :  { %v9717_v56 = vpop.f32.mrf.mxu0 }
 0x4b9   :  { %v9719_v58 = vpop.f32.mrf.mxu0 }
 0x4bb   :  { %v9721_v59 = vpop.f32.mrf.mxu0 }
 0x4bd   :  { %v8254_v62 = vpop.f32.mrf.mxu0 }
 0x4be   :  { %v6626_v41 = vadd.f32 %v8254_v62, %v8228_v51  ;;  %v6611_v51 = vadd.f32 %v9721_v59, %v9707_v50  ;;  %v6596_v50 = vadd.f32 %v9711_v53, %v9697_v44 }
 0x4bf   :  { %v6620_v1 = vpop.f32.mrf.mxu0 }
 0x4c1   :  { %v8257_v60 = vpop.f32.mrf.mxu0 }
 0x4c2   :  { %v6636_v48 = vadd.f32 %v8257_v60, %v8231_v54 }
 0x4c3   :  { %v6630_v4 = vpop.f32.mrf.mxu0 }
 0x4c4   :  { %v6631_v37 = vadd.f32 %v6630_v4, %v6436_v57  ;;  %v6774_v42 = vadd.f32 %v6733_v26, %v6636_v48  ;;  %v6616_v57 = vadd.f32 %v9719_v58, %v9705_v49  ;;  %v6708_v4 = vpop.permute.xlu1 %6707  ;;  %v6601_v49 = vadd.f32 %v9717_v56, %v9703_v47 }
 0x4c5   :  { %v8260_v8 = vpop.f32.mrf.mxu0  ;;  %v6769_v58 = vadd.f32 %v6708_v4, %v6611_v51 }
 0x4c6   :  { %v6646_v27 = vadd.f32 %v8260_v8, %v8234_v61  ;;  %v6621_v61 = vadd.f32 %v6620_v1, %v9709_v52  ;;  %v6790_v60 = vmax.f32 %v6774_v42, 0.0  ;;  %v6606_v52 = vadd.f32 %v9715_v55, %v9701_v46 }
 0x4c7   :  { %v6640_v10 = vpop.f32.mrf.mxu0  ;;  %v6591_v46 = vadd.f32 %v9713_v5, %v9699_v45  ;;  %v6798_v45 = vld [vmem:[%s9779_s7 + $0x8] sm:$0xff]  ;;  %v6799_v5 = vld [vmem:[%s9779_s7 + $0x10] sm:$0xff] }
 0x4c8   :  { %v6641_v32 = vadd.f32 %v6640_v10, %v6446_v2  ;;  %v6776_v34 = vadd.f32 %v6743_v14, %v6646_v27  ;;  %v6713_v2 = vpop.permute.xlu0 %6712  ;;  %v6771_v62 = vadd.f32 %v6718_v40, %v6621_v61  ;;  %v6698_v10 = vpop.permute.xlu1 %6697 }
 0x4c9   :  { %v8263_v12 = vpop.f32.mrf.mxu0  ;;  %v6770_v1 = vadd.f32 %v6713_v2, %v6616_v57  ;;  %v6767_v55 = vadd.f32 %v6698_v10, %v6601_v49 }
 0x4ca   :  { %v6656_v19 = vadd.f32 %v8263_v12, %v8237_v6  ;;  %v6775_v38 = vadd.f32 %v6738_v17, %v6641_v32  ;;  %v6792_v43 = vmax.f32 %v6776_v34, 0.0  ;;  %v6785_v12 = vmax.f32 %v6769_v58, 0.0 }
 0x4cb   :  { %v6650_v16 = vpop.f32.mrf.mxu0  ;;  %v6783_v17 = vmax.f32 %v6767_v55, 0.0 }
 0x4cc   :  { %v6651_v23 = vadd.f32 %v6650_v16, %v6456_v11  ;;  %v6778_v28 = vadd.f32 %v6753_v7, %v6656_v19  ;;  %v6791_v54 = vmax.f32 %v6775_v38, 0.0  ;;  %v6703_v8 = vpop.permute.xlu0 %6702  ;;  %v6786_v11 = vmax.f32 %v6770_v1, 0.0  ;;  %v6801_v19 = vld [vmem:[%s9779_s7 + $0x20] sm:$0xff] }
 0x4cd   :  { %v8266_v18 = vpop.f32.mrf.mxu0  ;;  %v6768_v59 = vadd.f32 %v6703_v8, %v6606_v52 }
 0x4ce   :  { %v6666_v20 = vadd.f32 %v8266_v18, %v8240_v15  ;;  %v6777_v33 = vadd.f32 %v6748_v9, %v6651_v23  ;;  %v6794_v35 = vmax.f32 %v6778_v28, 0.0  ;;  %v6787_v9 = vmax.f32 %v6771_v62, 0.0  ;;  %v6688_v15 = vpop.permute.xlu1 %6687  ;;  %v6800_v18 = vld [vmem:[%s9779_s7 + $0x18] sm:$0xff]  ;;  %v6966_v62 = vld [vmem:[%s9780_s9] sm:$0x3] }
 0x4cf   :  { %v6660_v22 = vpop.f32.mrf.mxu0  ;;  %v6784_v56 = vmax.f32 %v6768_v59, 0.0  ;;  %v6765_v16 = vadd.f32 %v6688_v15, %v6591_v46 }
 0x4d0   :  { %v6780_v24 = vadd.f32 %v6763_v63, %v6666_v20  ;;  %v6661_v25 = vadd.f32 %v6660_v22, %v6466_v21  ;;  %v6793_v39 = vmax.f32 %v6777_v33, 0.0  ;;  %v6773_v63 = vadd.f32 %v6728_v31, %v6631_v37  ;;  %v6693_v14 = vpop.permute.xlu0 %6692  ;;  %v6802_v20 = vld [vmem:[%s9779_s7 + $0x28] sm:$0xff]  ;;  %v6803_v21 = vld [vmem:[%s9779_s7 + $0x30] sm:$0xff]  ;;  %v6804_v22 = vld [vmem:[%s9779_s7 + $0x38] sm:$0xff] }
 0x4d1   :  { %v6766_v47 = vadd.f32 %v6693_v14, %v6596_v50  ;;  %v6781_v53 = vmax.f32 %v6765_v16, 0.0 }
 0x4d2   :  { %v6796_v29 = vmax.f32 %v6780_v24, 0.0  ;;  %v6779_v30 = vadd.f32 %v6758_v3, %v6661_v25  ;;  %v6772_v3 = vadd.f32 %v6723_v36, %v6626_v41  ;;  %v6789_v6 = vmax.f32 %v6773_v63, 0.0  ;;  %v6846_v27 = vpop.permute.xlu1 %6845 }
 0x4d3   :  { %v6782_v44 = vmax.f32 %v6766_v47, 0.0 }
 0x4d4   :  { %v6795_v13 = vmax.f32 %v6779_v30, 0.0  ;;  %8267 = vmatprep.subr.mxu1 %v6796_v29  ;;  %v6788_v7 = vmax.f32 %v6772_v3, 0.0  ;;  %v6851_v25 = vpop.permute.xlu0 %6850 }
 0x4d5   :  { %8268 = vmatpush3.msra.mxu1 %v6796_v29 }
 0x4d6   :  { %8269 = vmatprep.subr.mxu1 %v6795_v13  ;;  %v6836_v32 = vpop.permute.xlu1 %6835 }
 0x4d7   :  { %8270 = vmatpush3.msra.mxu1 %v6795_v13 }
 0x4d8   :  { %8271 = vmatprep.subr.mxu1 %v6794_v35  ;;  %v6841_v30 = vpop.permute.xlu0 %6840 }
 0x4d9   :  { %8272 = vmatpush3.msra.mxu1 %v6794_v35 }
 0x4da   :  { %8273 = vmatprep.subr.mxu1 %v6793_v39  ;;  %v6826_v40 = vpop.permute.xlu1 %6825 }
 0x4db   :  { %8274 = vmatpush3.msra.mxu1 %v6793_v39 }
 0x4dc   :  { %8275 = vmatprep.subr.mxu1 %v6792_v43  ;;  %v6831_v37 = vpop.permute.xlu0 %6830 }
 0x4dd   :  { %8276 = vmatpush3.msra.mxu1 %v6792_v43 }
 0x4de   :  { %8277 = vmatprep.subr.mxu1 %v6791_v54  ;;  %v6816_v57 = vpop.permute.xlu1 %6815 }
 0x4df   :  { %8278 = vmatpush3.msra.mxu1 %v6791_v54 }
 0x4e0   :  { %8279 = vmatprep.subr.mxu1 %v6790_v60  ;;  %v6821_v63 = vpop.permute.xlu0 %6820 }
 0x4e1   :  { %8280 = vmatpush3.msra.mxu1 %v6790_v60 }
 0x4e2   :  { %8281 = vmatprep.subr.mxu1 %v6789_v6 }
 0x4e3   :  { %8282 = vmatpush3.msra.mxu1 %v6789_v6 }
 0x4e4   :  { %8283 = vmatprep.subr.mxu1 %v6788_v7  ;;  %v6971_v6 = vpop.permute.xlu0 %6970 }
 0x4e5   :  { %8284 = vmatpush3.msra.mxu1 %v6788_v7 }
 0x4e6   :  { %8285 = vmatprep.subr.mxu1 %v6787_v9 }
 0x4e7   :  { %8286 = vmatpush3.msra.mxu1 %v6787_v9 }
 0x4e8   :  { %8287 = vmatprep.subr.mxu1 %v6786_v11 }
 0x4e9   :  { %8288 = vmatpush3.msra.mxu1 %v6786_v11 }
 0x4ea   :  { %8289 = vmatprep.subr.mxu1 %v6785_v12 }
 0x4eb   :  { %8290 = vmatpush3.msra.mxu1 %v6785_v12 }
 0x4ec   :  { %8291 = vmatprep.subr.mxu1 %v6784_v56 }
 0x4ed   :  { %8292 = vmatpush3.msra.mxu1 %v6784_v56 }
 0x4ee   :  { %8293 = vmatprep.subr.mxu1 %v6783_v17 }
 0x4ef   :  { %8294 = vmatpush3.msra.mxu1 %v6783_v17 }
 0x4f0   :  { %8295 = vmatprep.subr.mxu1 %v6782_v44 }
 0x4f1   :  { %8296 = vmatpush3.msra.mxu1 %v6782_v44 }
 0x4f2   :  { %8297 = vmatprep.subr.mxu1 %v6781_v53 }
 0x4f3   :  { %8298 = vmatpush3.msra.mxu1 %v6781_v53 }
 0x4f4   :  { %8300 = vmatmul.mubr.f32.vlgmr.msra.gmra.mxu1 %v6798_v45 }
 0x4f5   :  { %8302 = vmatprep.mubr.f32.mxu1 %v6799_v5 }
 0x4f8   :  { %8303 = vmatmul.mubr.f32.gmra.mxu1 %v6800_v18 }
 0x4f9   :  { %8305 = vmatprep.mubr.f32.mxu1 %v6801_v19 }
 0x4fc   :  { %8306 = vmatmul.mubr.f32.gmra.mxu1 %v6802_v20 }
 0x4fd   :  { %8308 = vmatprep.mubr.f32.mxu1 %v6803_v21 }
 0x500   :  { %8309 = vmatmul.mubr.f32.gmra.mxu1 %v6804_v22 }
 0x5b4   :  { %v8301_v23 = vpop.f32.mrf.mxu1 }
 0x5b5   :  { %v6925_v54 = vadd.f32 %v8301_v23, %v6821_v63 }
 0x5b6   :  { %v6919_v24 = vpop.f32.mrf.mxu1 }
 0x5b7   :  { %v6920_v3 = vadd.f32 %v6919_v24, %v6816_v57  ;;  %v6959_v4 = vmax.f32 %v6925_v54, 0.0 }
 0x5b8   :  { %v8304_v26 = vpop.f32.mrf.mxu1 }
 0x5b9   :  { %v6935_v41 = vadd.f32 %v8304_v26, %v6831_v37  ;;  %v6958_v51 = vmax.f32 %v6920_v3, 0.0 }
 0x5ba   :  { %v6929_v28 = vpop.f32.mrf.mxu1 }
 0x5bb   :  { %v6930_v43 = vadd.f32 %v6929_v28, %v6826_v40  ;;  %v6961_v2 = vmax.f32 %v6935_v41, 0.0 }
 0x5bc   :  { %v8307_v29 = vpop.f32.mrf.mxu1 }
 0x5bd   :  { %v6945_v34 = vadd.f32 %v8307_v29, %v6841_v30  ;;  %v6960_v60 = vmax.f32 %v6930_v43, 0.0 }
 0x5be   :  { %v6939_v31 = vpop.f32.mrf.mxu1 }
 0x5bf   :  { %v6940_v38 = vadd.f32 %v6939_v31, %v6836_v32  ;;  %v6963_v42 = vmax.f32 %v6945_v34, 0.0 }
 0x5c0   :  { %v8310_v33 = vpop.f32.mrf.mxu1 }
 0x5c1   :  { %v6955_v13 = vadd.f32 %v8310_v33, %v6851_v25  ;;  %v6962_v61 = vmax.f32 %v6940_v38, 0.0 }
 0x5c2   :  { %v6949_v48 = vpop.f32.mrf.mxu1 }
 0x5c3   :  { %v6965_v35 = vmax.f32 %v6955_v13, 0.0  ;;  %v6950_v36 = vadd.f32 %v6949_v48, %v6846_v27 }
 0x5c5   :  { %v6964_v39 = vmax.f32 %v6950_v36, 0.0  ;;  %8312 = vmatpush3.msra.mxu0 %v6965_v35 }
 0x5c6   :  { %8313 = vmatprep.subr.mxu0 %v8336_v0 }
 0x5c7   :  { %8314 = vmatpush3.msra.mxu0 %v6964_v39 }
 0x5c8   :  { %8315 = vmatprep.subr.mxu0 %v8336_v0 }
 0x5c9   :  { %8316 = vmatpush3.msra.mxu0 %v6963_v42 }
 0x5ca   :  { %8317 = vmatprep.subr.mxu0 %v8336_v0 }
 0x5cb   :  { %8318 = vmatpush3.msra.mxu0 %v6962_v61 }
 0x5cc   :  { %8319 = vmatprep.subr.mxu0 %v8336_v0 }
 0x5cd   :  { %8320 = vmatpush3.msra.mxu0 %v6961_v2 }
 0x5ce   :  { %8321 = vmatprep.subr.mxu0 %v8336_v0 }
 0x5cf   :  { %8322 = vmatpush3.msra.mxu0 %v6960_v60 }
 0x5d0   :  { %8323 = vmatprep.subr.mxu0 %v8336_v0 }
 0x5d1   :  { %8324 = vmatpush3.msra.mxu0 %v6959_v4 }
 0x5d2   :  { %8325 = vmatprep.subr.mxu0 %v8336_v0 }
 0x5d3   :  { %8326 = vmatpush3.msra.mxu0 %v6958_v51 }
 0x5d4   :  { %8328 = vmatmul.mubr.msk.f32.vlgmr.msra.gmra.mxu0 %vm6973_vm6, %v6966_v62 }
 0x694   :  { %v7043_v52 = vpop.f32.mrf.mxu0 }
 0x695   :  { %v7044_v1 = vadd.f32 %v7043_v52, %v6971_v6 }
 0x696   :  { %v8329_v7 = vpop.f32.mrf.mxu0 }
 0x697   :  { %7048 = vst.msk [vmem:[%s9781_s11] sm:$0x3] %vm7047_vm7, %v7044_v1 }

</bundles_post_ra>
